<compile_context>
chip_gen: v6e
topology: v6e:2x2x1
jax: 0.10.0
libtpu: 0.0.40
codegen_flags: <defaults>
</compile_context>

<pallas_src>
import numpy as np
import jax
import jax.numpy as jnp
from jax.experimental import pallas as pl
from jax.experimental.pallas import tpu as pltpu


def _round_up(v, m):
    return ((v + m - 1) // m) * m


def _make_fused_kernel(D, H, W, K, C, c_pad, S, PAD):
    HW = H * W
    p = K // 2

    def kernel(x_ref, w1_ref, b1_ref, w2_ref, b2_ref, w3_ref, b3_ref, hwm_ref,
               o_ref, hbuf_ref, tbuf_ref):
        # x_ref: (1, C, S) -- one batch element, spatial flattened on the lane axis.
        x = x_ref[0]                                                        # (C, S) f32

        # conv1 (1x1x1, C -> c_exp) + ReLU + conv2 (1x1x1, c_exp -> c_pad):
        # bf16 MXU operands with f32 accumulation; bias/ReLU stay on the VPU in f32.
        h1 = jnp.dot(w1_ref[...], x.astype(jnp.bfloat16),
                     preferred_element_type=jnp.float32) + b1_ref[...]      # (c_exp, S)
        h1 = jnp.maximum(h1, 0.0)                                           # nn.ReLU(True)
        h2 = jnp.dot(w2_ref[...], h1.astype(jnp.bfloat16),
                     preferred_element_type=jnp.float32) + b2_ref[...]      # (c_pad, S)

        # Stage h2 (bf16) into the flat buffer whose PAD edges are zero, so every
        # KxKxK tap is a static lane-offset window and D-border taps read exact zeros.
        # Only the two edges are zeroed (interior fully overwritten), every step, so
        # correctness holds when the 'parallel' batch axis is split across cores.
        hbuf_ref[:, :PAD] = jnp.zeros((c_pad, PAD), jnp.bfloat16)
        hbuf_ref[:, PAD + S:] = jnp.zeros((c_pad, PAD), jnp.bfloat16)
        hbuf_ref[:, PAD:PAD + S] = h2.astype(jnp.bfloat16)

        # conv3 (KxKxK, c_lin -> C) + bias + residual.  The K*K taps of one kd-plane
        # are masked (H/W borders only) and stacked into tbuf, then consumed by ONE
        # deep-contraction (K*K*c_pad) matmul per plane.
        acc = x + b3_ref[...]                                               # (C, S) f32
        for kd in range(K):
            for kh in range(K):
                for kw in range(K):
                    j = kh * K + kw
                    f = (kd - p) * HW + (kh - p) * W + (kw - p)             # flat tap shift
                    tap = hbuf_ref[:, PAD + f:PAD + f + S]                  # (c_pad, S) bf16
                    tbuf_ref[j * c_pad:(j + 1) * c_pad, :] = tap * hwm_ref[j]
            acc = acc + jnp.dot(w3_ref[kd], tbuf_ref[...],
                                preferred_element_type=jnp.float32)
        o_ref[0] = acc.astype(o_ref.dtype)

    return kernel


def _weight_norm(v, g):
    # torch.nn.utils.weight_norm (default dim=0): w = g * v / ||v||_2,
    # norm over every dim except the output-channel dim.  Kept in f32.
    norm = jnp.sqrt(jnp.sum(v.astype(jnp.float32) ** 2, axis=(1, 2, 3, 4), keepdims=True))
    return (g.reshape(-1, 1, 1, 1, 1).astype(jnp.float32) * v.astype(jnp.float32) / norm)


def init_params(key, n_feats, kernel_size, expand=6, linear=0.8, dtype=jnp.float32):
    c_exp = n_feats * expand
    c_lin = int(n_feats * linear)
    ks = jax.random.split(key, 9)

    def conv_wn(kv, kg, kb, out_c, in_c, k):
        v = jax.random.normal(kv, (out_c, in_c, k, k, k), dtype) * 0.1
        g = jax.random.uniform(kg, (out_c,), dtype, minval=0.5, maxval=1.5)
        b = jax.random.normal(kb, (out_c,), dtype) * 0.05
        return {"v": v, "g": g, "b": b}

    return {
        "conv1": conv_wn(ks[0], ks[1], ks[2], c_exp, n_feats, 1),
        "conv2": conv_wn(ks[3], ks[4], ks[5], c_lin, c_exp, 1),
        "conv3": conv_wn(ks[6], ks[7], ks[8], n_feats, c_lin, kernel_size),
    }


def _build_hw_masks(D, H, W, K):
    """0/1 masks, one per (kh, kw) tap, marking flattened positions whose shifted
    source stays inside the H/W extent.  D-border taps need no mask: their flat
    shift lands in the zeroed PAD region of the staging buffer."""
    p = K // 2
    hh = np.arange(H)[:, None]
    ww = np.arange(W)[None, :]
    masks = []
    for kh in range(K):
        for kw in range(K):
            oh, ow = kh - p, kw - p
            valid = ((hh + oh >= 0) & (hh + oh < H) &
                     (ww + ow >= 0) & (ww + ow < W))                       # (H, W)
            masks.append(np.broadcast_to(valid[None], (D, H, W)).reshape(1, D * H * W))
    return np.stack(masks, axis=0).astype(np.float32)                      # (K*K, 1, S)


def wdsr_b_block_3d(x, params, kernel_size, res_scale=1):
    """Pallas implementation of WDSRBBlock3D.forward.  x: (N, C, D, H, W) float32."""
    del res_scale  # stored by the PyTorch module but unused in its forward
    N, C, D, H, W = x.shape
    K = kernel_size
    p = K // 2
    S = D * H * W
    HW = H * W

    # Weight-norm reparameterization + matmul-friendly layouts (tiny host-side glue).
    w1 = _weight_norm(params["conv1"]["v"], params["conv1"]["g"])    # (c_exp, C, 1,1,1)
    w2 = _weight_norm(params["conv2"]["v"], params["conv2"]["g"])    # (c_lin, c_exp, 1,1,1)
    w3 = _weight_norm(params["conv3"]["v"], params["conv3"]["g"])    # (C, c_lin, K,K,K)
    c_exp = w1.shape[0]
    c_lin = w2.shape[0]
    c_pad = _round_up(c_lin, 8)              # sublane-aligned "linear" width (zero padded)

    # conv1 / conv2 as channel matmuls (bf16 MXU operands); conv2 padded to c_pad rows.
    w1_mat = w1[:, :, 0, 0, 0].astype(jnp.bfloat16)                              # (c_exp, C)
    w2_mat = jnp.zeros((c_pad, c_exp), jnp.float32
                       ).at[:c_lin].set(w2[:, :, 0, 0, 0]).astype(jnp.bfloat16)  # (c_pad, c_exp)
    b1 = params["conv1"]["b"].astype(jnp.float32).reshape(c_exp, 1)
    b2 = jnp.zeros((c_pad, 1), jnp.float32
                   ).at[:c_lin].set(params["conv2"]["b"].astype(jnp.float32).reshape(-1, 1))
    b3 = params["conv3"]["b"].astype(jnp.float32).reshape(C, 1)

    # conv3 grouped per kd-plane: w3_grp[kd][o, j*c_pad + c] = w3[o, c, kd, kh, kw],
    # j = kh*K + kw -- matches the row layout of the in-kernel tap staging buffer.
    w3_pad = jnp.zeros((C, c_pad, K, K, K), jnp.float32).at[:, :c_lin].set(w3)
    w3_grp = jnp.transpose(w3_pad, (2, 0, 3, 4, 1)).reshape(K, C, K * K * c_pad)
    w3_grp = w3_grp.astype(jnp.bfloat16)

    # Channels-first, spatial flattened onto lanes -- free reshape, no transpose.
    x3 = x.reshape(N, C, S)
    hw_mask = jnp.asarray(_build_hw_masks(D, H, W, K), dtype=jnp.bfloat16)   # (K*K, 1, S)

    Fmax = p * (HW + W + 1)                  # max |flat tap shift|
    PAD = _round_up(Fmax, 128)               # lane-aligned pad of the staging buffer
    G = K * K * c_pad                        # grouped contraction depth for conv3

    # Explicit VMEM budget: x/out blocks (double-buffered), grid-invariant operands
    # (double-buffered), both bf16 scratch buffers, f32 temporaries; 2x headroom,
    # never below the 32 MiB default, capped at v7x's 64 MiB physical VMEM.
    invariant_bytes = (2 * (w1_mat.size + w2_mat.size + w3_grp.size + hw_mask.size)
                       + 4 * (b1.size + b2.size + b3.size))
    per_step_bytes = (2 * 2 * C * S * 4                     # x + out blocks, 2 buffers
                      + 2 * invariant_bytes                 # invariant inputs, 2 buffers
                      + c_pad * (S + 2 * PAD) * 2           # hbuf (bf16)
                      + G * S * 2                           # tbuf (bf16)
                      + (c_exp + c_pad + 3 * C) * S * 4)    # live f32 temporaries
    vmem_limit = int(min(64 * 1024 * 1024, max(32 * 1024 * 1024, 2 * per_step_bytes)))

    flops = 2 * N * S * (C * c_exp + c_exp * c_pad + K * G * C)
    bytes_accessed = 4 * 2 * N * C * S + int(invariant_bytes)

    out3 = pl.pallas_call(
        _make_fused_kernel(D, H, W, K, C, c_pad, S, PAD),
        out_shape=jax.ShapeDtypeStruct((N, C, S), jnp.float32),
        grid=(N,),
        in_specs=[
            pl.BlockSpec((1, C, S), lambda n: (n, 0, 0)),            # x (per batch elem)
            pl.BlockSpec((c_exp, C), lambda n: (0, 0)),              # w1 (bf16)
            pl.BlockSpec((c_exp, 1), lambda n: (0, 0)),              # b1 (f32)
            pl.BlockSpec((c_pad, c_exp), lambda n: (0, 0)),          # w2 (bf16, padded)
            pl.BlockSpec((c_pad, 1), lambda n: (0, 0)),              # b2 (f32, padded)
            pl.BlockSpec((K, C, G), lambda n: (0, 0, 0)),            # w3 grouped taps (bf16)
            pl.BlockSpec((C, 1), lambda n: (0, 0)),                  # b3 (f32)
            pl.BlockSpec((K * K, 1, S), lambda n: (0, 0, 0)),        # H/W border masks
        ],
        out_specs=pl.BlockSpec((1, C, S), lambda n: (n, 0, 0)),
        scratch_shapes=[pltpu.VMEM((c_pad, S + 2 * PAD), jnp.bfloat16),   # h2 staging
                        pltpu.VMEM((G, S), jnp.bfloat16)],                # grouped taps
        compiler_params=pltpu.CompilerParams(
            dimension_semantics=("parallel",),        # N=2 grid steps feed both v7x TCs
            vmem_limit_bytes=vmem_limit),
        cost_estimate=pl.CostEstimate(flops=flops, transcendentals=0,
                                      bytes_accessed=bytes_accessed),
    )(x3, w1_mat, b1, w2_mat, b2, w3_grp, b3, hw_mask)

    return out3.reshape(N, C, D, H, W)


def _reference(x, params, kernel_size, operand_dtype=jnp.float32):
    """Pure-JAX reference (NCDHW).  With operand_dtype=bf16 it mirrors the kernel's
    MXU numerics (bf16 operands, f32 accumulation) for a tight comparison."""
    w1 = _weight_norm(params["conv1"]["v"], params["conv1"]["g"])
    w2 = _weight_norm(params["conv2"]["v"], params["conv2"]["g"])
    w3 = _weight_norm(params["conv3"]["v"], params["conv3"]["g"])
    b1, b2, b3 = (params[k]["b"] for k in ("conv1", "conv2", "conv3"))
    dn = jax.lax.conv_dimension_numbers(x.shape, w1.shape, ("NCDHW", "OIDHW", "NCDHW"))
    prec = (jax.lax.Precision.HIGHEST if operand_dtype == jnp.float32
            else jax.lax.Precision.DEFAULT)

    def conv(inp, w, b, pad):
        out = jax.lax.conv_general_dilated(
            inp.astype(operand_dtype), w.astype(operand_dtype),
            window_strides=(1, 1, 1), padding=[(pad, pad)] * 3,
            dimension_numbers=dn, precision=prec,
            preferred_element_type=jnp.float32)
        return out + b.reshape(1, -1, 1, 1, 1).astype(jnp.float32)

    h = conv(x, w1, b1, 0)
    h = jnp.maximum(h, 0.0)
    h = conv(h, w2, b2, 0)
    h = conv(h, w3, b3, kernel_size // 2)
    return h + x


if __name__ == "__main__":
    n_feats, kernel_size = 4, 3
    N, D, H, W = 2, 8, 8, 8

    key = jax.random.PRNGKey(0)
    kx, kp = jax.random.split(key)
    x = jax.random.normal(kx, (N, n_feats, D, H, W), jnp.float32)
    params = init_params(kp, n_feats, kernel_size)

    out = jax.block_until_ready(wdsr_b_block_3d(x, params, kernel_size))
    assert out.shape == x.shape and out.dtype == x.dtype

    # Tight check against a reference that mirrors the kernel's bf16-operand /
    # f32-accumulation MXU numerics, plus a coarser check against full-f32 math
    # (the only difference there is bf16 rounding of the matmul operands).
    ref_bf16 = jax.block_until_ready(_reference(x, params, kernel_size, jnp.bfloat16))
    ref_f32 = jax.block_until_ready(_reference(x, params, kernel_size, jnp.float32))
    np.testing.assert_allclose(np.asarray(out), np.asarray(ref_bf16), rtol=2e-3, atol=2e-3)
    np.testing.assert_allclose(np.asarray(out), np.asarray(ref_f32), rtol=5e-2, atol=5e-2)
    print("KERNEL_OK")
</pallas_src>

<mosaic_0001>
module attributes {stable_mosaic.version = 11 : i64} {
  func.func @kernel(%arg0: i32, %arg1: memref<1x4x512xf32, #tpu.memory_space<vmem>>, %arg2: memref<24x4xbf16, #tpu.memory_space<vmem>>, %arg3: memref<24x1xf32, #tpu.memory_space<vmem>>, %arg4: memref<8x24xbf16, #tpu.memory_space<vmem>>, %arg5: memref<8x1xf32, #tpu.memory_space<vmem>>, %arg6: memref<3x4x72xbf16, #tpu.memory_space<vmem>>, %arg7: memref<4x1xf32, #tpu.memory_space<vmem>>, %arg8: memref<9x1x512xbf16, #tpu.memory_space<vmem>>, %arg9: memref<1x4x512xf32, #tpu.memory_space<vmem>>, %arg10: memref<8x768xbf16, #tpu.memory_space<vmem>>, %arg11: memref<72x512xbf16, #tpu.memory_space<vmem>>) attributes {dimension_semantics = [#tpu.dimension_semantics<parallel>], iteration_bounds = array<i64: 2>, scalar_prefetch = 0 : i64, scratch_operands = 2 : i64, tpu.core_type = #tpu.core_type<tc>, window_params = [{transform_indices = @transform_0, window_bounds = array<i64: 1, 4, 512>}, {pipeline_mode = #tpu.pipeline_mode<synchronous>, transform_indices = @transform_1, window_bounds = array<i64: 24, 4>}, {pipeline_mode = #tpu.pipeline_mode<synchronous>, transform_indices = @transform_2, window_bounds = array<i64: 24, 1>}, {pipeline_mode = #tpu.pipeline_mode<synchronous>, transform_indices = @transform_3, window_bounds = array<i64: 8, 24>}, {pipeline_mode = #tpu.pipeline_mode<synchronous>, transform_indices = @transform_4, window_bounds = array<i64: 8, 1>}, {pipeline_mode = #tpu.pipeline_mode<synchronous>, transform_indices = @transform_5, window_bounds = array<i64: 3, 4, 72>}, {pipeline_mode = #tpu.pipeline_mode<synchronous>, transform_indices = @transform_6, window_bounds = array<i64: 4, 1>}, {pipeline_mode = #tpu.pipeline_mode<synchronous>, transform_indices = @transform_7, window_bounds = array<i64: 9, 1, 512>}, {transform_indices = @transform_8, window_bounds = array<i64: 1, 4, 512>}]} {
    %c0 = arith.constant 0 : index
    %c0_0 = arith.constant 0 : index
    %c0_1 = arith.constant 0 : index
    %0 = vector.load %arg1[%c0, %c0_0, %c0_1] : memref<1x4x512xf32, #tpu.memory_space<vmem>>, vector<1x4x512xf32>
    %1 = vector.shape_cast %0 : vector<1x4x512xf32> to vector<4x512xf32>
    %c0_2 = arith.constant 0 : index
    %c0_3 = arith.constant 0 : index
    %2 = vector.load %arg2[%c0_2, %c0_3] : memref<24x4xbf16, #tpu.memory_space<vmem>>, vector<24x4xbf16>
    %3 = arith.truncf %1 : vector<4x512xf32> to vector<4x512xbf16>
    %cst = arith.constant dense<0.000000e+00> : vector<24x512xf32>
    %4 = tpu.matmul %2, %3, %cst {dimension_numbers = #tpu.dot_dimension_numbers<[1], [0], [0], [1], [0, 0, 1, 1], [], []>} : vector<24x4xbf16>, vector<4x512xbf16>, vector<24x512xf32> -> vector<24x512xf32>
    %c0_4 = arith.constant 0 : index
    %c0_5 = arith.constant 0 : index
    %5 = vector.load %arg3[%c0_4, %c0_5] : memref<24x1xf32, #tpu.memory_space<vmem>>, vector<24x1xf32>
    %6 = vector.broadcast %5 : vector<24x1xf32> to vector<24x512xf32>
    %7 = arith.addf %4, %6 : vector<24x512xf32>
    %cst_6 = arith.constant 0.000000e+00 : f32
    %8 = vector.broadcast %cst_6 : f32 to vector<24x512xf32>
    %9 = arith.maximumf %7, %8 : vector<24x512xf32>
    %c0_7 = arith.constant 0 : index
    %c0_8 = arith.constant 0 : index
    %10 = vector.load %arg4[%c0_7, %c0_8] : memref<8x24xbf16, #tpu.memory_space<vmem>>, vector<8x24xbf16>
    %11 = arith.truncf %9 : vector<24x512xf32> to vector<24x512xbf16>
    %cst_9 = arith.constant dense<0.000000e+00> : vector<8x512xf32>
    %12 = tpu.matmul %10, %11, %cst_9 {dimension_numbers = #tpu.dot_dimension_numbers<[1], [0], [0], [1], [0, 0, 1, 1], [], []>} : vector<8x24xbf16>, vector<24x512xbf16>, vector<8x512xf32> -> vector<8x512xf32>
    %c0_10 = arith.constant 0 : index
    %c0_11 = arith.constant 0 : index
    %13 = vector.load %arg5[%c0_10, %c0_11] : memref<8x1xf32, #tpu.memory_space<vmem>>, vector<8x1xf32>
    %14 = vector.broadcast %13 : vector<8x1xf32> to vector<8x512xf32>
    %15 = arith.addf %12, %14 : vector<8x512xf32>
    %cst_12 = arith.constant 0.000000e+00 : bf16
    %16 = vector.broadcast %cst_12 : bf16 to vector<8x128xbf16>
    %c0_13 = arith.constant 0 : index
    %c0_14 = arith.constant 0 : index
    %17 = vector.load %arg10[%c0_13, %c0_14] : memref<8x768xbf16, #tpu.memory_space<vmem>>, vector<8x128xbf16>
    tpu.vector_store %arg10[%c0_13, %c0_14], %16 {strides = array<i32>} : memref<8x768xbf16, #tpu.memory_space<vmem>>, vector<8x128xbf16>,
    %cst_15 = arith.constant 0.000000e+00 : bf16
    %18 = vector.broadcast %cst_15 : bf16 to vector<8x128xbf16>
    %c0_16 = arith.constant 0 : index
    %c640 = arith.constant 640 : index
    %19 = vector.load %arg10[%c0_16, %c640] : memref<8x768xbf16, #tpu.memory_space<vmem>>, vector<8x128xbf16>
    tpu.vector_store %arg10[%c0_16, %c640], %18 {strides = array<i32>} : memref<8x768xbf16, #tpu.memory_space<vmem>>, vector<8x128xbf16>,
    %20 = arith.truncf %15 : vector<8x512xf32> to vector<8x512xbf16>
    %c0_17 = arith.constant 0 : index
    %c128 = arith.constant 128 : index
    %21 = vector.load %arg10[%c0_17, %c128] : memref<8x768xbf16, #tpu.memory_space<vmem>>, vector<8x512xbf16>
    tpu.vector_store %arg10[%c0_17, %c128], %20 {strides = array<i32>} : memref<8x768xbf16, #tpu.memory_space<vmem>>, vector<8x512xbf16>,
    %c0_18 = arith.constant 0 : index
    %c0_19 = arith.constant 0 : index
    %22 = vector.load %arg7[%c0_18, %c0_19] : memref<4x1xf32, #tpu.memory_space<vmem>>, vector<4x1xf32>
    %23 = vector.broadcast %22 : vector<4x1xf32> to vector<4x512xf32>
    %24 = arith.addf %1, %23 : vector<4x512xf32>
    %c0_20 = arith.constant 0 : index
    %c55 = arith.constant 55 : index
    %25 = vector.load %arg10[%c0_20, %c55] : memref<8x768xbf16, #tpu.memory_space<vmem>>, vector<8x512xbf16>
    %c0_21 = arith.constant 0 : index
    %c0_22 = arith.constant 0 : index
    %c0_23 = arith.constant 0 : index
    %26 = vector.load %arg8[%c0_21, %c0_22, %c0_23] : memref<9x1x512xbf16, #tpu.memory_space<vmem>>, vector<1x1x512xbf16>
    %27 = vector.shape_cast %26 : vector<1x1x512xbf16> to vector<1x512xbf16>
    %28 = vector.broadcast %27 : vector<1x512xbf16> to vector<8x512xbf16>
    %29 = arith.mulf %25, %28 : vector<8x512xbf16>
    %c0_24 = arith.constant 0 : index
    %c0_25 = arith.constant 0 : index
    %30 = vector.load %arg11[%c0_24, %c0_25] : memref<72x512xbf16, #tpu.memory_space<vmem>>, vector<8x512xbf16>
    tpu.vector_store %arg11[%c0_24, %c0_25], %29 {strides = array<i32>} : memref<72x512xbf16, #tpu.memory_space<vmem>>, vector<8x512xbf16>,
    %c0_26 = arith.constant 0 : index
    %c56 = arith.constant 56 : index
    %31 = vector.load %arg10[%c0_26, %c56] : memref<8x768xbf16, #tpu.memory_space<vmem>>, vector<8x512xbf16>
    %c1 = arith.constant 1 : index
    %c0_27 = arith.constant 0 : index
    %c0_28 = arith.constant 0 : index
    %32 = vector.load %arg8[%c1, %c0_27, %c0_28] : memref<9x1x512xbf16, #tpu.memory_space<vmem>>, vector<1x1x512xbf16>
    %33 = vector.shape_cast %32 : vector<1x1x512xbf16> to vector<1x512xbf16>
    %34 = vector.broadcast %33 : vector<1x512xbf16> to vector<8x512xbf16>
    %35 = arith.mulf %31, %34 : vector<8x512xbf16>
    %c8 = arith.constant 8 : index
    %c0_29 = arith.constant 0 : index
    %36 = vector.load %arg11[%c8, %c0_29] : memref<72x512xbf16, #tpu.memory_space<vmem>>, vector<8x512xbf16>
    tpu.vector_store %arg11[%c8, %c0_29], %35 {strides = array<i32>} : memref<72x512xbf16, #tpu.memory_space<vmem>>, vector<8x512xbf16>,
    %c0_30 = arith.constant 0 : index
    %c57 = arith.constant 57 : index
    %37 = vector.load %arg10[%c0_30, %c57] : memref<8x768xbf16, #tpu.memory_space<vmem>>, vector<8x512xbf16>
    %c2 = arith.constant 2 : index
    %c0_31 = arith.constant 0 : index
    %c0_32 = arith.constant 0 : index
    %38 = vector.load %arg8[%c2, %c0_31, %c0_32] : memref<9x1x512xbf16, #tpu.memory_space<vmem>>, vector<1x1x512xbf16>
    %39 = vector.shape_cast %38 : vector<1x1x512xbf16> to vector<1x512xbf16>
    %40 = vector.broadcast %39 : vector<1x512xbf16> to vector<8x512xbf16>
    %41 = arith.mulf %37, %40 : vector<8x512xbf16>
    %c16 = arith.constant 16 : index
    %c0_33 = arith.constant 0 : index
    %42 = vector.load %arg11[%c16, %c0_33] : memref<72x512xbf16, #tpu.memory_space<vmem>>, vector<8x512xbf16>
    tpu.vector_store %arg11[%c16, %c0_33], %41 {strides = array<i32>} : memref<72x512xbf16, #tpu.memory_space<vmem>>, vector<8x512xbf16>,
    %c0_34 = arith.constant 0 : index
    %c63 = arith.constant 63 : index
    %43 = vector.load %arg10[%c0_34, %c63] : memref<8x768xbf16, #tpu.memory_space<vmem>>, vector<8x512xbf16>
    %c3 = arith.constant 3 : index
    %c0_35 = arith.constant 0 : index
    %c0_36 = arith.constant 0 : index
    %44 = vector.load %arg8[%c3, %c0_35, %c0_36] : memref<9x1x512xbf16, #tpu.memory_space<vmem>>, vector<1x1x512xbf16>
    %45 = vector.shape_cast %44 : vector<1x1x512xbf16> to vector<1x512xbf16>
    %46 = vector.broadcast %45 : vector<1x512xbf16> to vector<8x512xbf16>
    %47 = arith.mulf %43, %46 : vector<8x512xbf16>
    %c24 = arith.constant 24 : index
    %c0_37 = arith.constant 0 : index
    %48 = vector.load %arg11[%c24, %c0_37] : memref<72x512xbf16, #tpu.memory_space<vmem>>, vector<8x512xbf16>
    tpu.vector_store %arg11[%c24, %c0_37], %47 {strides = array<i32>} : memref<72x512xbf16, #tpu.memory_space<vmem>>, vector<8x512xbf16>,
    %c0_38 = arith.constant 0 : index
    %c64 = arith.constant 64 : index
    %49 = vector.load %arg10[%c0_38, %c64] : memref<8x768xbf16, #tpu.memory_space<vmem>>, vector<8x512xbf16>
    %c4 = arith.constant 4 : index
    %c0_39 = arith.constant 0 : index
    %c0_40 = arith.constant 0 : index
    %50 = vector.load %arg8[%c4, %c0_39, %c0_40] : memref<9x1x512xbf16, #tpu.memory_space<vmem>>, vector<1x1x512xbf16>
    %51 = vector.shape_cast %50 : vector<1x1x512xbf16> to vector<1x512xbf16>
    %52 = vector.broadcast %51 : vector<1x512xbf16> to vector<8x512xbf16>
    %53 = arith.mulf %49, %52 : vector<8x512xbf16>
    %c32 = arith.constant 32 : index
    %c0_41 = arith.constant 0 : index
    %54 = vector.load %arg11[%c32, %c0_41] : memref<72x512xbf16, #tpu.memory_space<vmem>>, vector<8x512xbf16>
    tpu.vector_store %arg11[%c32, %c0_41], %53 {strides = array<i32>} : memref<72x512xbf16, #tpu.memory_space<vmem>>, vector<8x512xbf16>,
    %c0_42 = arith.constant 0 : index
    %c65 = arith.constant 65 : index
    %55 = vector.load %arg10[%c0_42, %c65] : memref<8x768xbf16, #tpu.memory_space<vmem>>, vector<8x512xbf16>
    %c5 = arith.constant 5 : index
    %c0_43 = arith.constant 0 : index
    %c0_44 = arith.constant 0 : index
    %56 = vector.load %arg8[%c5, %c0_43, %c0_44] : memref<9x1x512xbf16, #tpu.memory_space<vmem>>, vector<1x1x512xbf16>
    %57 = vector.shape_cast %56 : vector<1x1x512xbf16> to vector<1x512xbf16>
    %58 = vector.broadcast %57 : vector<1x512xbf16> to vector<8x512xbf16>
    %59 = arith.mulf %55, %58 : vector<8x512xbf16>
    %c40 = arith.constant 40 : index
    %c0_45 = arith.constant 0 : index
    %60 = vector.load %arg11[%c40, %c0_45] : memref<72x512xbf16, #tpu.memory_space<vmem>>, vector<8x512xbf16>
    tpu.vector_store %arg11[%c40, %c0_45], %59 {strides = array<i32>} : memref<72x512xbf16, #tpu.memory_space<vmem>>, vector<8x512xbf16>,
    %c0_46 = arith.constant 0 : index
    %c71 = arith.constant 71 : index
    %61 = vector.load %arg10[%c0_46, %c71] : memref<8x768xbf16, #tpu.memory_space<vmem>>, vector<8x512xbf16>
    %c6 = arith.constant 6 : index
    %c0_47 = arith.constant 0 : index
    %c0_48 = arith.constant 0 : index
    %62 = vector.load %arg8[%c6, %c0_47, %c0_48] : memref<9x1x512xbf16, #tpu.memory_space<vmem>>, vector<1x1x512xbf16>
    %63 = vector.shape_cast %62 : vector<1x1x512xbf16> to vector<1x512xbf16>
    %64 = vector.broadcast %63 : vector<1x512xbf16> to vector<8x512xbf16>
    %65 = arith.mulf %61, %64 : vector<8x512xbf16>
    %c48 = arith.constant 48 : index
    %c0_49 = arith.constant 0 : index
    %66 = vector.load %arg11[%c48, %c0_49] : memref<72x512xbf16, #tpu.memory_space<vmem>>, vector<8x512xbf16>
    tpu.vector_store %arg11[%c48, %c0_49], %65 {strides = array<i32>} : memref<72x512xbf16, #tpu.memory_space<vmem>>, vector<8x512xbf16>,
    %c0_50 = arith.constant 0 : index
    %c72 = arith.constant 72 : index
    %67 = vector.load %arg10[%c0_50, %c72] : memref<8x768xbf16, #tpu.memory_space<vmem>>, vector<8x512xbf16>
    %c7 = arith.constant 7 : index
    %c0_51 = arith.constant 0 : index
    %c0_52 = arith.constant 0 : index
    %68 = vector.load %arg8[%c7, %c0_51, %c0_52] : memref<9x1x512xbf16, #tpu.memory_space<vmem>>, vector<1x1x512xbf16>
    %69 = vector.shape_cast %68 : vector<1x1x512xbf16> to vector<1x512xbf16>
    %70 = vector.broadcast %69 : vector<1x512xbf16> to vector<8x512xbf16>
    %71 = arith.mulf %67, %70 : vector<8x512xbf16>
    %c56_53 = arith.constant 56 : index
    %c0_54 = arith.constant 0 : index
    %72 = vector.load %arg11[%c56_53, %c0_54] : memref<72x512xbf16, #tpu.memory_space<vmem>>, vector<8x512xbf16>
    tpu.vector_store %arg11[%c56_53, %c0_54], %71 {strides = array<i32>} : memref<72x512xbf16, #tpu.memory_space<vmem>>, vector<8x512xbf16>,
    %c0_55 = arith.constant 0 : index
    %c73 = arith.constant 73 : index
    %73 = vector.load %arg10[%c0_55, %c73] : memref<8x768xbf16, #tpu.memory_space<vmem>>, vector<8x512xbf16>
    %c8_56 = arith.constant 8 : index
    %c0_57 = arith.constant 0 : index
    %c0_58 = arith.constant 0 : index
    %74 = vector.load %arg8[%c8_56, %c0_57, %c0_58] : memref<9x1x512xbf16, #tpu.memory_space<vmem>>, vector<1x1x512xbf16>
    %75 = vector.shape_cast %74 : vector<1x1x512xbf16> to vector<1x512xbf16>
    %76 = vector.broadcast %75 : vector<1x512xbf16> to vector<8x512xbf16>
    %77 = arith.mulf %73, %76 : vector<8x512xbf16>
    %c64_59 = arith.constant 64 : index
    %c0_60 = arith.constant 0 : index
    %78 = vector.load %arg11[%c64_59, %c0_60] : memref<72x512xbf16, #tpu.memory_space<vmem>>, vector<8x512xbf16>
    tpu.vector_store %arg11[%c64_59, %c0_60], %77 {strides = array<i32>} : memref<72x512xbf16, #tpu.memory_space<vmem>>, vector<8x512xbf16>,
    %c0_61 = arith.constant 0 : index
    %c0_62 = arith.constant 0 : index
    %c0_63 = arith.constant 0 : index
    %79 = vector.load %arg6[%c0_61, %c0_62, %c0_63] : memref<3x4x72xbf16, #tpu.memory_space<vmem>>, vector<1x4x72xbf16>
    %80 = vector.shape_cast %79 : vector<1x4x72xbf16> to vector<4x72xbf16>
    %c0_64 = arith.constant 0 : index
    %c0_65 = arith.constant 0 : index
    %81 = vector.load %arg11[%c0_64, %c0_65] : memref<72x512xbf16, #tpu.memory_space<vmem>>, vector<72x512xbf16>
    %cst_66 = arith.constant dense<0.000000e+00> : vector<4x512xf32>
    %82 = tpu.matmul %80, %81, %cst_66 {dimension_numbers = #tpu.dot_dimension_numbers<[1], [0], [0], [1], [0, 0, 1, 1], [], []>} : vector<4x72xbf16>, vector<72x512xbf16>, vector<4x512xf32> -> vector<4x512xf32>
    %83 = arith.addf %24, %82 : vector<4x512xf32>
    %c0_67 = arith.constant 0 : index
    %c119 = arith.constant 119 : index
    %84 = vector.load %arg10[%c0_67, %c119] : memref<8x768xbf16, #tpu.memory_space<vmem>>, vector<8x512xbf16>
    %c0_68 = arith.constant 0 : index
    %c0_69 = arith.constant 0 : index
    %c0_70 = arith.constant 0 : index
    %85 = vector.load %arg8[%c0_68, %c0_69, %c0_70] : memref<9x1x512xbf16, #tpu.memory_space<vmem>>, vector<1x1x512xbf16>
    %86 = vector.shape_cast %85 : vector<1x1x512xbf16> to vector<1x512xbf16>
    %87 = vector.broadcast %86 : vector<1x512xbf16> to vector<8x512xbf16>
    %88 = arith.mulf %84, %87 : vector<8x512xbf16>
    %c0_71 = arith.constant 0 : index
    %c0_72 = arith.constant 0 : index
    %89 = vector.load %arg11[%c0_71, %c0_72] : memref<72x512xbf16, #tpu.memory_space<vmem>>, vector<8x512xbf16>
    tpu.vector_store %arg11[%c0_71, %c0_72], %88 {strides = array<i32>} : memref<72x512xbf16, #tpu.memory_space<vmem>>, vector<8x512xbf16>,
    %c0_73 = arith.constant 0 : index
    %c120 = arith.constant 120 : index
    %90 = vector.load %arg10[%c0_73, %c120] : memref<8x768xbf16, #tpu.memory_space<vmem>>, vector<8x512xbf16>
    %c1_74 = arith.constant 1 : index
    %c0_75 = arith.constant 0 : index
    %c0_76 = arith.constant 0 : index
    %91 = vector.load %arg8[%c1_74, %c0_75, %c0_76] : memref<9x1x512xbf16, #tpu.memory_space<vmem>>, vector<1x1x512xbf16>
    %92 = vector.shape_cast %91 : vector<1x1x512xbf16> to vector<1x512xbf16>
    %93 = vector.broadcast %92 : vector<1x512xbf16> to vector<8x512xbf16>
    %94 = arith.mulf %90, %93 : vector<8x512xbf16>
    %c8_77 = arith.constant 8 : index
    %c0_78 = arith.constant 0 : index
    %95 = vector.load %arg11[%c8_77, %c0_78] : memref<72x512xbf16, #tpu.memory_space<vmem>>, vector<8x512xbf16>
    tpu.vector_store %arg11[%c8_77, %c0_78], %94 {strides = array<i32>} : memref<72x512xbf16, #tpu.memory_space<vmem>>, vector<8x512xbf16>,
    %c0_79 = arith.constant 0 : index
    %c121 = arith.constant 121 : index
    %96 = vector.load %arg10[%c0_79, %c121] : memref<8x768xbf16, #tpu.memory_space<vmem>>, vector<8x512xbf16>
    %c2_80 = arith.constant 2 : index
    %c0_81 = arith.constant 0 : index
    %c0_82 = arith.constant 0 : index
    %97 = vector.load %arg8[%c2_80, %c0_81, %c0_82] : memref<9x1x512xbf16, #tpu.memory_space<vmem>>, vector<1x1x512xbf16>
    %98 = vector.shape_cast %97 : vector<1x1x512xbf16> to vector<1x512xbf16>
    %99 = vector.broadcast %98 : vector<1x512xbf16> to vector<8x512xbf16>
    %100 = arith.mulf %96, %99 : vector<8x512xbf16>
    %c16_83 = arith.constant 16 : index
    %c0_84 = arith.constant 0 : index
    %101 = vector.load %arg11[%c16_83, %c0_84] : memref<72x512xbf16, #tpu.memory_space<vmem>>, vector<8x512xbf16>
    tpu.vector_store %arg11[%c16_83, %c0_84], %100 {strides = array<i32>} : memref<72x512xbf16, #tpu.memory_space<vmem>>, vector<8x512xbf16>,
    %c0_85 = arith.constant 0 : index
    %c127 = arith.constant 127 : index
    %102 = vector.load %arg10[%c0_85, %c127] : memref<8x768xbf16, #tpu.memory_space<vmem>>, vector<8x512xbf16>
    %c3_86 = arith.constant 3 : index
    %c0_87 = arith.constant 0 : index
    %c0_88 = arith.constant 0 : index
    %103 = vector.load %arg8[%c3_86, %c0_87, %c0_88] : memref<9x1x512xbf16, #tpu.memory_space<vmem>>, vector<1x1x512xbf16>
    %104 = vector.shape_cast %103 : vector<1x1x512xbf16> to vector<1x512xbf16>
    %105 = vector.broadcast %104 : vector<1x512xbf16> to vector<8x512xbf16>
    %106 = arith.mulf %102, %105 : vector<8x512xbf16>
    %c24_89 = arith.constant 24 : index
    %c0_90 = arith.constant 0 : index
    %107 = vector.load %arg11[%c24_89, %c0_90] : memref<72x512xbf16, #tpu.memory_space<vmem>>, vector<8x512xbf16>
    tpu.vector_store %arg11[%c24_89, %c0_90], %106 {strides = array<i32>} : memref<72x512xbf16, #tpu.memory_space<vmem>>, vector<8x512xbf16>,
    %c0_91 = arith.constant 0 : index
    %c128_92 = arith.constant 128 : index
    %108 = vector.load %arg10[%c0_91, %c128_92] : memref<8x768xbf16, #tpu.memory_space<vmem>>, vector<8x512xbf16>
    %c4_93 = arith.constant 4 : index
    %c0_94 = arith.constant 0 : index
    %c0_95 = arith.constant 0 : index
    %109 = vector.load %arg8[%c4_93, %c0_94, %c0_95] : memref<9x1x512xbf16, #tpu.memory_space<vmem>>, vector<1x1x512xbf16>
    %110 = vector.shape_cast %109 : vector<1x1x512xbf16> to vector<1x512xbf16>
    %111 = vector.broadcast %110 : vector<1x512xbf16> to vector<8x512xbf16>
    %112 = arith.mulf %108, %111 : vector<8x512xbf16>
    %c32_96 = arith.constant 32 : index
    %c0_97 = arith.constant 0 : index
    %113 = vector.load %arg11[%c32_96, %c0_97] : memref<72x512xbf16, #tpu.memory_space<vmem>>, vector<8x512xbf16>
    tpu.vector_store %arg11[%c32_96, %c0_97], %112 {strides = array<i32>} : memref<72x512xbf16, #tpu.memory_space<vmem>>, vector<8x512xbf16>,
    %c0_98 = arith.constant 0 : index
    %c129 = arith.constant 129 : index
    %114 = vector.load %arg10[%c0_98, %c129] : memref<8x768xbf16, #tpu.memory_space<vmem>>, vector<8x512xbf16>
    %c5_99 = arith.constant 5 : index
    %c0_100 = arith.constant 0 : index
    %c0_101 = arith.constant 0 : index
    %115 = vector.load %arg8[%c5_99, %c0_100, %c0_101] : memref<9x1x512xbf16, #tpu.memory_space<vmem>>, vector<1x1x512xbf16>
    %116 = vector.shape_cast %115 : vector<1x1x512xbf16> to vector<1x512xbf16>
    %117 = vector.broadcast %116 : vector<1x512xbf16> to vector<8x512xbf16>
    %118 = arith.mulf %114, %117 : vector<8x512xbf16>
    %c40_102 = arith.constant 40 : index
    %c0_103 = arith.constant 0 : index
    %119 = vector.load %arg11[%c40_102, %c0_103] : memref<72x512xbf16, #tpu.memory_space<vmem>>, vector<8x512xbf16>
    tpu.vector_store %arg11[%c40_102, %c0_103], %118 {strides = array<i32>} : memref<72x512xbf16, #tpu.memory_space<vmem>>, vector<8x512xbf16>,
    %c0_104 = arith.constant 0 : index
    %c135 = arith.constant 135 : index
    %120 = vector.load %arg10[%c0_104, %c135] : memref<8x768xbf16, #tpu.memory_space<vmem>>, vector<8x512xbf16>
    %c6_105 = arith.constant 6 : index
    %c0_106 = arith.constant 0 : index
    %c0_107 = arith.constant 0 : index
    %121 = vector.load %arg8[%c6_105, %c0_106, %c0_107] : memref<9x1x512xbf16, #tpu.memory_space<vmem>>, vector<1x1x512xbf16>
    %122 = vector.shape_cast %121 : vector<1x1x512xbf16> to vector<1x512xbf16>
    %123 = vector.broadcast %122 : vector<1x512xbf16> to vector<8x512xbf16>
    %124 = arith.mulf %120, %123 : vector<8x512xbf16>
    %c48_108 = arith.constant 48 : index
    %c0_109 = arith.constant 0 : index
    %125 = vector.load %arg11[%c48_108, %c0_109] : memref<72x512xbf16, #tpu.memory_space<vmem>>, vector<8x512xbf16>
    tpu.vector_store %arg11[%c48_108, %c0_109], %124 {strides = array<i32>} : memref<72x512xbf16, #tpu.memory_space<vmem>>, vector<8x512xbf16>,
    %c0_110 = arith.constant 0 : index
    %c136 = arith.constant 136 : index
    %126 = vector.load %arg10[%c0_110, %c136] : memref<8x768xbf16, #tpu.memory_space<vmem>>, vector<8x512xbf16>
    %c7_111 = arith.constant 7 : index
    %c0_112 = arith.constant 0 : index
    %c0_113 = arith.constant 0 : index
    %127 = vector.load %arg8[%c7_111, %c0_112, %c0_113] : memref<9x1x512xbf16, #tpu.memory_space<vmem>>, vector<1x1x512xbf16>
    %128 = vector.shape_cast %127 : vector<1x1x512xbf16> to vector<1x512xbf16>
    %129 = vector.broadcast %128 : vector<1x512xbf16> to vector<8x512xbf16>
    %130 = arith.mulf %126, %129 : vector<8x512xbf16>
    %c56_114 = arith.constant 56 : index
    %c0_115 = arith.constant 0 : index
    %131 = vector.load %arg11[%c56_114, %c0_115] : memref<72x512xbf16, #tpu.memory_space<vmem>>, vector<8x512xbf16>
    tpu.vector_store %arg11[%c56_114, %c0_115], %130 {strides = array<i32>} : memref<72x512xbf16, #tpu.memory_space<vmem>>, vector<8x512xbf16>,
    %c0_116 = arith.constant 0 : index
    %c137 = arith.constant 137 : index
    %132 = vector.load %arg10[%c0_116, %c137] : memref<8x768xbf16, #tpu.memory_space<vmem>>, vector<8x512xbf16>
    %c8_117 = arith.constant 8 : index
    %c0_118 = arith.constant 0 : index
    %c0_119 = arith.constant 0 : index
    %133 = vector.load %arg8[%c8_117, %c0_118, %c0_119] : memref<9x1x512xbf16, #tpu.memory_space<vmem>>, vector<1x1x512xbf16>
    %134 = vector.shape_cast %133 : vector<1x1x512xbf16> to vector<1x512xbf16>
    %135 = vector.broadcast %134 : vector<1x512xbf16> to vector<8x512xbf16>
    %136 = arith.mulf %132, %135 : vector<8x512xbf16>
    %c64_120 = arith.constant 64 : index
    %c0_121 = arith.constant 0 : index
    %137 = vector.load %arg11[%c64_120, %c0_121] : memref<72x512xbf16, #tpu.memory_space<vmem>>, vector<8x512xbf16>
    tpu.vector_store %arg11[%c64_120, %c0_121], %136 {strides = array<i32>} : memref<72x512xbf16, #tpu.memory_space<vmem>>, vector<8x512xbf16>,
    %c1_122 = arith.constant 1 : index
    %c0_123 = arith.constant 0 : index
    %c0_124 = arith.constant 0 : index
    %138 = vector.load %arg6[%c1_122, %c0_123, %c0_124] : memref<3x4x72xbf16, #tpu.memory_space<vmem>>, vector<1x4x72xbf16>
    %139 = vector.shape_cast %138 : vector<1x4x72xbf16> to vector<4x72xbf16>
    %c0_125 = arith.constant 0 : index
    %c0_126 = arith.constant 0 : index
    %140 = vector.load %arg11[%c0_125, %c0_126] : memref<72x512xbf16, #tpu.memory_space<vmem>>, vector<72x512xbf16>
    %cst_127 = arith.constant dense<0.000000e+00> : vector<4x512xf32>
    %141 = tpu.matmul %139, %140, %cst_127 {dimension_numbers = #tpu.dot_dimension_numbers<[1], [0], [0], [1], [0, 0, 1, 1], [], []>} : vector<4x72xbf16>, vector<72x512xbf16>, vector<4x512xf32> -> vector<4x512xf32>
    %142 = arith.addf %83, %141 : vector<4x512xf32>
    %c0_128 = arith.constant 0 : index
    %c183 = arith.constant 183 : index
    %143 = vector.load %arg10[%c0_128, %c183] : memref<8x768xbf16, #tpu.memory_space<vmem>>, vector<8x512xbf16>
    %c0_129 = arith.constant 0 : index
    %c0_130 = arith.constant 0 : index
    %c0_131 = arith.constant 0 : index
    %144 = vector.load %arg8[%c0_129, %c0_130, %c0_131] : memref<9x1x512xbf16, #tpu.memory_space<vmem>>, vector<1x1x512xbf16>
    %145 = vector.shape_cast %144 : vector<1x1x512xbf16> to vector<1x512xbf16>
    %146 = vector.broadcast %145 : vector<1x512xbf16> to vector<8x512xbf16>
    %147 = arith.mulf %143, %146 : vector<8x512xbf16>
    %c0_132 = arith.constant 0 : index
    %c0_133 = arith.constant 0 : index
    %148 = vector.load %arg11[%c0_132, %c0_133] : memref<72x512xbf16, #tpu.memory_space<vmem>>, vector<8x512xbf16>
    tpu.vector_store %arg11[%c0_132, %c0_133], %147 {strides = array<i32>} : memref<72x512xbf16, #tpu.memory_space<vmem>>, vector<8x512xbf16>,
    %c0_134 = arith.constant 0 : index
    %c184 = arith.constant 184 : index
    %149 = vector.load %arg10[%c0_134, %c184] : memref<8x768xbf16, #tpu.memory_space<vmem>>, vector<8x512xbf16>
    %c1_135 = arith.constant 1 : index
    %c0_136 = arith.constant 0 : index
    %c0_137 = arith.constant 0 : index
    %150 = vector.load %arg8[%c1_135, %c0_136, %c0_137] : memref<9x1x512xbf16, #tpu.memory_space<vmem>>, vector<1x1x512xbf16>
    %151 = vector.shape_cast %150 : vector<1x1x512xbf16> to vector<1x512xbf16>
    %152 = vector.broadcast %151 : vector<1x512xbf16> to vector<8x512xbf16>
    %153 = arith.mulf %149, %152 : vector<8x512xbf16>
    %c8_138 = arith.constant 8 : index
    %c0_139 = arith.constant 0 : index
    %154 = vector.load %arg11[%c8_138, %c0_139] : memref<72x512xbf16, #tpu.memory_space<vmem>>, vector<8x512xbf16>
    tpu.vector_store %arg11[%c8_138, %c0_139], %153 {strides = array<i32>} : memref<72x512xbf16, #tpu.memory_space<vmem>>, vector<8x512xbf16>,
    %c0_140 = arith.constant 0 : index
    %c185 = arith.constant 185 : index
    %155 = vector.load %arg10[%c0_140, %c185] : memref<8x768xbf16, #tpu.memory_space<vmem>>, vector<8x512xbf16>
    %c2_141 = arith.constant 2 : index
    %c0_142 = arith.constant 0 : index
    %c0_143 = arith.constant 0 : index
    %156 = vector.load %arg8[%c2_141, %c0_142, %c0_143] : memref<9x1x512xbf16, #tpu.memory_space<vmem>>, vector<1x1x512xbf16>
    %157 = vector.shape_cast %156 : vector<1x1x512xbf16> to vector<1x512xbf16>
    %158 = vector.broadcast %157 : vector<1x512xbf16> to vector<8x512xbf16>
    %159 = arith.mulf %155, %158 : vector<8x512xbf16>
    %c16_144 = arith.constant 16 : index
    %c0_145 = arith.constant 0 : index
    %160 = vector.load %arg11[%c16_144, %c0_145] : memref<72x512xbf16, #tpu.memory_space<vmem>>, vector<8x512xbf16>
    tpu.vector_store %arg11[%c16_144, %c0_145], %159 {strides = array<i32>} : memref<72x512xbf16, #tpu.memory_space<vmem>>, vector<8x512xbf16>,
    %c0_146 = arith.constant 0 : index
    %c191 = arith.constant 191 : index
    %161 = vector.load %arg10[%c0_146, %c191] : memref<8x768xbf16, #tpu.memory_space<vmem>>, vector<8x512xbf16>
    %c3_147 = arith.constant 3 : index
    %c0_148 = arith.constant 0 : index
    %c0_149 = arith.constant 0 : index
    %162 = vector.load %arg8[%c3_147, %c0_148, %c0_149] : memref<9x1x512xbf16, #tpu.memory_space<vmem>>, vector<1x1x512xbf16>
    %163 = vector.shape_cast %162 : vector<1x1x512xbf16> to vector<1x512xbf16>
    %164 = vector.broadcast %163 : vector<1x512xbf16> to vector<8x512xbf16>
    %165 = arith.mulf %161, %164 : vector<8x512xbf16>
    %c24_150 = arith.constant 24 : index
    %c0_151 = arith.constant 0 : index
    %166 = vector.load %arg11[%c24_150, %c0_151] : memref<72x512xbf16, #tpu.memory_space<vmem>>, vector<8x512xbf16>
    tpu.vector_store %arg11[%c24_150, %c0_151], %165 {strides = array<i32>} : memref<72x512xbf16, #tpu.memory_space<vmem>>, vector<8x512xbf16>,
    %c0_152 = arith.constant 0 : index
    %c192 = arith.constant 192 : index
    %167 = vector.load %arg10[%c0_152, %c192] : memref<8x768xbf16, #tpu.memory_space<vmem>>, vector<8x512xbf16>
    %c4_153 = arith.constant 4 : index
    %c0_154 = arith.constant 0 : index
    %c0_155 = arith.constant 0 : index
    %168 = vector.load %arg8[%c4_153, %c0_154, %c0_155] : memref<9x1x512xbf16, #tpu.memory_space<vmem>>, vector<1x1x512xbf16>
    %169 = vector.shape_cast %168 : vector<1x1x512xbf16> to vector<1x512xbf16>
    %170 = vector.broadcast %169 : vector<1x512xbf16> to vector<8x512xbf16>
    %171 = arith.mulf %167, %170 : vector<8x512xbf16>
    %c32_156 = arith.constant 32 : index
    %c0_157 = arith.constant 0 : index
    %172 = vector.load %arg11[%c32_156, %c0_157] : memref<72x512xbf16, #tpu.memory_space<vmem>>, vector<8x512xbf16>
    tpu.vector_store %arg11[%c32_156, %c0_157], %171 {strides = array<i32>} : memref<72x512xbf16, #tpu.memory_space<vmem>>, vector<8x512xbf16>,
    %c0_158 = arith.constant 0 : index
    %c193 = arith.constant 193 : index
    %173 = vector.load %arg10[%c0_158, %c193] : memref<8x768xbf16, #tpu.memory_space<vmem>>, vector<8x512xbf16>
    %c5_159 = arith.constant 5 : index
    %c0_160 = arith.constant 0 : index
    %c0_161 = arith.constant 0 : index
    %174 = vector.load %arg8[%c5_159, %c0_160, %c0_161] : memref<9x1x512xbf16, #tpu.memory_space<vmem>>, vector<1x1x512xbf16>
    %175 = vector.shape_cast %174 : vector<1x1x512xbf16> to vector<1x512xbf16>
    %176 = vector.broadcast %175 : vector<1x512xbf16> to vector<8x512xbf16>
    %177 = arith.mulf %173, %176 : vector<8x512xbf16>
    %c40_162 = arith.constant 40 : index
    %c0_163 = arith.constant 0 : index
    %178 = vector.load %arg11[%c40_162, %c0_163] : memref<72x512xbf16, #tpu.memory_space<vmem>>, vector<8x512xbf16>
    tpu.vector_store %arg11[%c40_162, %c0_163], %177 {strides = array<i32>} : memref<72x512xbf16, #tpu.memory_space<vmem>>, vector<8x512xbf16>,
    %c0_164 = arith.constant 0 : index
    %c199 = arith.constant 199 : index
    %179 = vector.load %arg10[%c0_164, %c199] : memref<8x768xbf16, #tpu.memory_space<vmem>>, vector<8x512xbf16>
    %c6_165 = arith.constant 6 : index
    %c0_166 = arith.constant 0 : index
    %c0_167 = arith.constant 0 : index
    %180 = vector.load %arg8[%c6_165, %c0_166, %c0_167] : memref<9x1x512xbf16, #tpu.memory_space<vmem>>, vector<1x1x512xbf16>
    %181 = vector.shape_cast %180 : vector<1x1x512xbf16> to vector<1x512xbf16>
    %182 = vector.broadcast %181 : vector<1x512xbf16> to vector<8x512xbf16>
    %183 = arith.mulf %179, %182 : vector<8x512xbf16>
    %c48_168 = arith.constant 48 : index
    %c0_169 = arith.constant 0 : index
    %184 = vector.load %arg11[%c48_168, %c0_169] : memref<72x512xbf16, #tpu.memory_space<vmem>>, vector<8x512xbf16>
    tpu.vector_store %arg11[%c48_168, %c0_169], %183 {strides = array<i32>} : memref<72x512xbf16, #tpu.memory_space<vmem>>, vector<8x512xbf16>,
    %c0_170 = arith.constant 0 : index
    %c200 = arith.constant 200 : index
    %185 = vector.load %arg10[%c0_170, %c200] : memref<8x768xbf16, #tpu.memory_space<vmem>>, vector<8x512xbf16>
    %c7_171 = arith.constant 7 : index
    %c0_172 = arith.constant 0 : index
    %c0_173 = arith.constant 0 : index
    %186 = vector.load %arg8[%c7_171, %c0_172, %c0_173] : memref<9x1x512xbf16, #tpu.memory_space<vmem>>, vector<1x1x512xbf16>
    %187 = vector.shape_cast %186 : vector<1x1x512xbf16> to vector<1x512xbf16>
    %188 = vector.broadcast %187 : vector<1x512xbf16> to vector<8x512xbf16>
    %189 = arith.mulf %185, %188 : vector<8x512xbf16>
    %c56_174 = arith.constant 56 : index
    %c0_175 = arith.constant 0 : index
    %190 = vector.load %arg11[%c56_174, %c0_175] : memref<72x512xbf16, #tpu.memory_space<vmem>>, vector<8x512xbf16>
    tpu.vector_store %arg11[%c56_174, %c0_175], %189 {strides = array<i32>} : memref<72x512xbf16, #tpu.memory_space<vmem>>, vector<8x512xbf16>,
    %c0_176 = arith.constant 0 : index
    %c201 = arith.constant 201 : index
    %191 = vector.load %arg10[%c0_176, %c201] : memref<8x768xbf16, #tpu.memory_space<vmem>>, vector<8x512xbf16>
    %c8_177 = arith.constant 8 : index
    %c0_178 = arith.constant 0 : index
    %c0_179 = arith.constant 0 : index
    %192 = vector.load %arg8[%c8_177, %c0_178, %c0_179] : memref<9x1x512xbf16, #tpu.memory_space<vmem>>, vector<1x1x512xbf16>
    %193 = vector.shape_cast %192 : vector<1x1x512xbf16> to vector<1x512xbf16>
    %194 = vector.broadcast %193 : vector<1x512xbf16> to vector<8x512xbf16>
    %195 = arith.mulf %191, %194 : vector<8x512xbf16>
    %c64_180 = arith.constant 64 : index
    %c0_181 = arith.constant 0 : index
    %196 = vector.load %arg11[%c64_180, %c0_181] : memref<72x512xbf16, #tpu.memory_space<vmem>>, vector<8x512xbf16>
    tpu.vector_store %arg11[%c64_180, %c0_181], %195 {strides = array<i32>} : memref<72x512xbf16, #tpu.memory_space<vmem>>, vector<8x512xbf16>,
    %c2_182 = arith.constant 2 : index
    %c0_183 = arith.constant 0 : index
    %c0_184 = arith.constant 0 : index
    %197 = vector.load %arg6[%c2_182, %c0_183, %c0_184] : memref<3x4x72xbf16, #tpu.memory_space<vmem>>, vector<1x4x72xbf16>
    %198 = vector.shape_cast %197 : vector<1x4x72xbf16> to vector<4x72xbf16>
    %c0_185 = arith.constant 0 : index
    %c0_186 = arith.constant 0 : index
    %199 = vector.load %arg11[%c0_185, %c0_186] : memref<72x512xbf16, #tpu.memory_space<vmem>>, vector<72x512xbf16>
    %cst_187 = arith.constant dense<0.000000e+00> : vector<4x512xf32>
    %200 = tpu.matmul %198, %199, %cst_187 {dimension_numbers = #tpu.dot_dimension_numbers<[1], [0], [0], [1], [0, 0, 1, 1], [], []>} : vector<4x72xbf16>, vector<72x512xbf16>, vector<4x512xf32> -> vector<4x512xf32>
    %201 = arith.addf %142, %200 : vector<4x512xf32>
    %c0_188 = arith.constant 0 : index
    %c0_189 = arith.constant 0 : index
    %c0_190 = arith.constant 0 : index
    %202 = vector.load %arg9[%c0_188, %c0_189, %c0_190] : memref<1x4x512xf32, #tpu.memory_space<vmem>>, vector<1x4x512xf32>
    %203 = vector.shape_cast %202 : vector<1x4x512xf32> to vector<4x512xf32>
    %204 = vector.shape_cast %201 : vector<4x512xf32> to vector<1x4x512xf32>
    tpu.vector_store %arg9[%c0_188, %c0_189, %c0_190], %204 {strides = array<i32>} : memref<1x4x512xf32, #tpu.memory_space<vmem>>, vector<1x4x512xf32>,
    return
  }
  func.func @transform_0(%arg0: i32) -> (i32, i32, i32) {
    %c0_i32 = arith.constant 0 : i32
    %c0_i32_0 = arith.constant 0 : i32
    %c0_i32_1 = arith.constant 0 : i32
    return %arg0, %c0_i32, %c0_i32_0 : i32, i32, i32
  }
  func.func @transform_1(%arg0: i32) -> (i32, i32) {
    %c0_i32 = arith.constant 0 : i32
    %c0_i32_0 = arith.constant 0 : i32
    %c0_i32_1 = arith.constant 0 : i32
    return %c0_i32, %c0_i32_0 : i32, i32
  }
  func.func @transform_2(%arg0: i32) -> (i32, i32) {
    %c0_i32 = arith.constant 0 : i32
    %c0_i32_0 = arith.constant 0 : i32
    %c0_i32_1 = arith.constant 0 : i32
    return %c0_i32, %c0_i32_0 : i32, i32
  }
  func.func @transform_3(%arg0: i32) -> (i32, i32) {
    %c0_i32 = arith.constant 0 : i32
    %c0_i32_0 = arith.constant 0 : i32
    %c0_i32_1 = arith.constant 0 : i32
    return %c0_i32, %c0_i32_0 : i32, i32
  }
  func.func @transform_4(%arg0: i32) -> (i32, i32) {
    %c0_i32 = arith.constant 0 : i32
    %c0_i32_0 = arith.constant 0 : i32
    %c0_i32_1 = arith.constant 0 : i32
    return %c0_i32, %c0_i32_0 : i32, i32
  }
  func.func @transform_5(%arg0: i32) -> (i32, i32, i32) {
    %c0_i32 = arith.constant 0 : i32
    %c0_i32_0 = arith.constant 0 : i32
    %c0_i32_1 = arith.constant 0 : i32
    %c0_i32_2 = arith.constant 0 : i32
    return %c0_i32, %c0_i32_0, %c0_i32_1 : i32, i32, i32
  }
  func.func @transform_6(%arg0: i32) -> (i32, i32) {
    %c0_i32 = arith.constant 0 : i32
    %c0_i32_0 = arith.constant 0 : i32
    %c0_i32_1 = arith.constant 0 : i32
    return %c0_i32, %c0_i32_0 : i32, i32
  }
  func.func @transform_7(%arg0: i32) -> (i32, i32, i32) {
    %c0_i32 = arith.constant 0 : i32
    %c0_i32_0 = arith.constant 0 : i32
    %c0_i32_1 = arith.constant 0 : i32
    %c0_i32_2 = arith.constant 0 : i32
    return %c0_i32, %c0_i32_0, %c0_i32_1 : i32, i32, i32
  }
  func.func @transform_8(%arg0: i32) -> (i32, i32, i32) {
    %c0_i32 = arith.constant 0 : i32
    %c0_i32_0 = arith.constant 0 : i32
    %c0_i32_1 = arith.constant 0 : i32
    return %arg0, %c0_i32, %c0_i32_0 : i32, i32, i32
  }
}

</mosaic_0001>

<bundles_post_ra>
// kernel: tpu_custom_call.1
= control target key start
LH: loop header
LB: loop body
LE: loop exit
PB: predicated region body
PF: predicated region fallthrough
CT: control target
= control target key end

     0   :  { %13 = vsyncpa [#allocation5], 0  ;;  %s5601_s0 = inlined_call_operand.vmem [shape: f32[2,4,512], index: 0, kind: input, shape index: {}]   ;;  %s5602_s1 = inlined_call_operand.vmem [shape: bf16[24,4], index: 1, kind: input, shape index: {}]   ;;  %s5603_s2 = inlined_call_operand.vmem [shape: f32[24,1], index: 2, kind: input, shape index: {}]   ;;  %s5604_s3 = inlined_call_operand.vmem [shape: bf16[8,24], index: 3, kind: input, shape index: {}]   ;;  %s5605_s4 = inlined_call_operand.vmem [shape: f32[8,1], index: 4, kind: input, shape index: {}]   ;;  %s5606_s5 = inlined_call_operand.vmem [shape: bf16[3,4,72], index: 5, kind: input, shape index: {}]   ;;  %s5607_s6 = inlined_call_operand.vmem [shape: f32[4,1], index: 6, kind: input, shape index: {}]   ;;  %s5608_s7 = inlined_call_operand.vmem [shape: bf16[9,1,512], index: 7, kind: input, shape index: {}]   ;;  %s5609_s8 = inlined_call_operand.hbm [shape: f32[2,4,512], index: 8, kind: output, shape index: {}]  }
   0x1   :  { %15 = vsyncpa [#allocation5 + $0x1], 0  ;;  %s4510_s27 = smov 0   ;;  %s4512_s28 = smov 0  }
   0x2   :  { %s4514_s29 = smov 0   ;;  %s4516_s30 = smov 0  }
   0x3 LB: > { %s4531_s9 = sadd.s32 4294967295, %s4442_s30   ;;  %s4106_s10 = sadd.s32 4294967294, %s4442_s30   ;;  %s4442_s30 = sphi %s4516_s30, %s5722_s30   ;;  %s4438_s29 = sphi %s4514_s29, %s5721_s29   ;;  %s4434_s28 = sphi %s4512_s28, %s5720_s28   ;;  %s4430_s27 = sphi %s4510_s27, %s5719_s27  }
   0x4   : > { %s4535_s11 = sadd.s32 1, %s4442_s30   ;;  %s201_s12 = sadd.s32 1, %s4438_s29 }
   0x5   : > { %s198_s13 = ssub.s32 %s4442_s30, %s4535_s11  ;;  %p211_p0 = scmp.ne.s32.totalorder %s4438_s29, %s4434_s28 }
   0x6   : > { %p199_p1 = scmp.eq.s32.totalorder %s198_s13, 0  ;;  %p212_p2 = scmp.eq.s32.totalorder %s4531_s9, 1 }
   0x7   : > { %p217_p3 = scmp.ne.s32.totalorder %s4434_s28, %s4430_s27  ;;  %p218_p4 = scmp.eq.s32.totalorder %s4106_s10, 1 }
   0x8   : > { %s4546_s14 = scalar_select %p199_p1, %s4438_s29, %s201_s12  }
   0x9   : > { %p4548_p5 = por %p212_p2, %p211_p0  ;;  %p4552_p6 = por %p218_p4, %p217_p3 }
   0xa   : > { %p4109_p7 = scmp.ge.s32.totalorder %s4442_s30, 1  ;;  %p265_p8 = scmp.lt.s32.totalorder %s4442_s30, 3 }
   0xc   : > { %p266_p9 = pnand %p4109_p7, %p265_p8 }
   0xe   : > { %269 = sbr.rel (%p266_p9) target bundleno = 925 (0x39d), region = 52 }
  0x13   : > { %p299_p10 = scmp.lt.s32.totalorder %s4531_s9, 1  ;;  %v5626_v0 = vmov 0   ;;  %v322_v1 = vld [vmem:[%s5603_s2 + $0x10] sm:$0xff]  ;;  %v321_v2 = vld [vmem:[%s5603_s2 + $0x8] sm:$0xff]  ;;  %v320_v3 = vld [vmem:[%s5603_s2] sm:$0xff]  ;;  %vm353_vm0 = vcmask 1041408   ;;  %v622_v17 = vlaneseq }
  0x14   : > { %398 = vmatprep.mubr.bf16.mxu0 %v5626_v0  ;;  %594 = vst [vmem:[#allocation2] sm:$0xf] %v5626_v0  ;;  %595 = vst [vmem:[#allocation2 + $0x14] sm:$0xf] %v5626_v0  ;;  %449 = vmatprep.mubr.bf16.mxu1 %v5626_v0  ;;  %v489_v4 = vld [vmem:[%s5605_s4] sm:$0xff]  ;;  %vm346_vm1 = vcmask 31744  }
  0x15   : > { %s300_s19 = scalar_select %p299_p10, %s4531_s9, 1  ;;  %4374 = vset.pattern.permute.xlu0 %v5626_v0  ;;  %4375 = vset.pattern.permute.xlu1 %v5626_v0  ;;  %v4378_v15 = vld [vmem:[%s5602_s1] sm:$0xff]   ;;  %v4379_v16 = vld [vmem:[%s5602_s1 + $0x8] ss:$0 sps:$4 sm:$0xff]   ;;  %v4445_v18 = vmov 1966171168  }
  0x16   : > { %335 = vperm.xlu0 %4374, %v322_v1   ;;  %330 = vperm.xlu1 %4375, %v321_v2   ;;  %v643_v19 = vunpack.c.l.s4 %v4445_v18  ;;  %v4595_v20 = vshrl.u32 %v622_v17, 7  ;;  %v4159_v22 = vld.sshfl [vmem:[%s5608_s7 + $0x20] sm:$0x33 pattern:$0x75316420]  ;;  %s5622_s17 = smov 73  }
  0x17   : > { %s4311_s22 = sshll.u32 %s300_s19, 4  ;;  %v1475_v24 = vcombine.high %v4159_v22, %v4159_v22  ;;  %v4151_v27 = vld.sshfl [vmem:[%s5608_s7 + $0x18] sm:$0x33 pattern:$0x75316420]  ;;  %s5653_s20 = smov 71  }
  0x18   : > { %s4578_s10 = scalar_lea.vmem %s5601_s0, %s4311_s22  ;;  %5659 = vst [vmem:[#allocation7_spill] sm:$0xff] %v4595_v20  ;;  %v644_v21 = vunpack.c.0.s8 %v643_v19  ;;  %v1269_v30 = vcombine.high %v4151_v27, %v4151_v27  ;;  %v4609_v31 = vsub.s32 0, %v4595_v20  ;;  %v4155_v38 = vld.sshfl [vmem:[%s5608_s7 + $0x1c] sm:$0x33 pattern:$0x75316420] }
  0x19   : > { %v305_v5 = vld [vmem:[%s4578_s10] sm:$0xff]  ;;  %v306_v6 = vld [vmem:[%s4578_s10 + $0x8] sm:$0xff]  ;;  %v1372_v42 = vcombine.high %v4155_v38, %v4155_v38  ;;  %v4143_v54 = vld.sshfl [vmem:[%s5608_s7 + $0x10] sm:$0x33 pattern:$0x75316420] }
  0x1a   : > { %v312_v7 = vcombine.high %v305_v5, %v305_v5  ;;  %v313_v8 = vcombine.high %v306_v6, %v306_v6  ;;  %v316_v9 = vpack.c.bf16 %v305_v5, %v305_v5  ;;  %v318_v10 = vpack.c.bf16 %v306_v6, %v306_v6  ;;  %325 = vperm.xlu0 %4374, %v320_v3   ;;  %s5620_s23 = smov 72   ;;  %s4449_s26 = smov 64  }
  0x1b   : > { %492 = vperm.xlu1 %4375, %v489_v4   ;;  %v4601_v23 = vsub.s32 %v644_v21, %v4595_v20  ;;  %5661 = vst [vmem:[#allocation9_spill] sm:$0xff] %v4609_v31  ;;  %v1062_v58 = vcombine.high %v4143_v54, %v4143_v54  ;;  %s5624_s18 = smov 65   ;;  %s4451_s22 = smov 57   ;;  %vm499_vm2 = vcmask 1043456   ;;  %vm495_vm3 = vcmask 195584  }
  0x1c   : > { %v317_v11 = vpack.c.bf16 %v312_v7, %v312_v7  ;;  %v319_v12 = vpack.c.bf16 %v313_v8, %v313_v8  ;;  %v355_v13 = vsel %vm353_vm0, %v316_v9, 0  ;;  %v361_v14 = vsel %vm353_vm0, %v318_v10, 0  ;;  %v4147_v7 = vld.sshfl [vmem:[%s5608_s7 + $0x14] sm:$0x33 pattern:$0x75316420] }
  0x1d   : > { %5660 = vst [vmem:[#allocation8_spill] sm:$0xff] %v4601_v23  ;;  %v1482_v25 = vrot.slane %v4159_v22, %v4601_v23  ;;  %v1489_v26 = vrot.slane %v1475_v24, %v4601_v23  ;;  %v1276_v36 = vrot.slane %v4151_v27, %v4601_v23  ;;  %v1283_v37 = vrot.slane %v1269_v30, %v4601_v23  ;;  %s4452_s24 = smov 63   ;;  %s4453_s25 = smov 55  }
  0x1e   : > { %4115 = vmatprep.subr.msk.bf16.mxu0 %vm353_vm0, %v317_v11  ;;  %4118 = vmatprep.subr.msk.bf16.mxu1 %vm353_vm0, %v319_v12  ;;  %v1379_v49 = vrot.slane %v4155_v38, %v4601_v23  ;;  %v1386_v53 = vrot.slane %v1372_v42, %v4601_v23  ;;  %v1069_v5 = vrot.slane %v4143_v54, %v4601_v23  ;;  %v4139_v42 = vld.sshfl [vmem:[%s5608_s7 + $0xc] sm:$0x33 pattern:$0x75316420]  ;;  %s5610_s12 = smov 56   ;;  %s5612_s13 = smov 9  }
  0x1f   : > { %381 = vmatpush1.bf16.msra.mxu0 %v355_v13  ;;  %432 = vmatpush1.bf16.msra.mxu1 %v361_v14  ;;  %v1490_v28 = vcombine.high %v1482_v25, %v1482_v25  ;;  %v1491_v29 = vcombine.high %v1489_v26, %v1489_v26  ;;  %v1493_v34 = vpack.i.b16 %v1482_v25, %v1482_v25  ;;  %v4135_v25 = vld.sshfl [vmem:[%s5608_s7 + $0x8] sm:$0x33 pattern:$0x75316420]  ;;  %s5614_s19 = smov 7   ;;  %s5616_s21 = smov 8  }
  0x20   : > { %v1500_v35 = vpack.i.b16 %v1489_v26, %v1489_v26  ;;  %v1284_v44 = vcombine.high %v1276_v36, %v1276_v36  ;;  %v1285_v45 = vcombine.high %v1283_v37, %v1283_v37  ;;  %v1287_v47 = vpack.i.b16 %v1276_v36, %v1276_v36 }
  0x21   : > { %v1507_v32 = vpack.i.b16 %v1490_v28, %v1490_v28  ;;  %v1514_v33 = vpack.i.b16 %v1491_v29, %v1491_v29  ;;  %v1498_v41 = vrot.slane %v1493_v34, %v4609_v31  ;;  %v1294_v48 = vpack.i.b16 %v1283_v37, %v1283_v37 }
  0x22   : > { %4116 = vmatmul.mubr.msk.bf16.vlgmr.msra.gmra.mxu0 %vm346_vm1, %v4378_v15  ;;  %4119 = vmatmul.mubr.msk.bf16.vlgmr.msra.gmra.mxu1 %vm346_vm1, %v4378_v15  ;;  %v1505_v43 = vrot.slane %v1500_v35, %v4609_v31  ;;  %v1301_v51 = vpack.i.b16 %v1284_v44, %v1284_v44  ;;  %v1308_v52 = vpack.i.b16 %v1285_v45, %v1285_v45  ;;  %vm726_vm4 = vcmask 596992  }
  0x23   : > { %408 = vmatprep.mubr.bf16.mxu0 %v5626_v0  ;;  %459 = vmatprep.mubr.bf16.mxu1 %v5626_v0  ;;  %v1512_v39 = vrot.slane %v1507_v32, %v4609_v31  ;;  %v1519_v40 = vrot.slane %v1514_v33, %v4609_v31  ;;  %v1292_v55 = vrot.slane %v1287_v47, %v4609_v31  ;;  %vm936_vm5 = vcmask 580608  }
  0x24   : > { %v4623_v50 = vcombine.low %v1498_v41, %v1505_v43  ;;  %v1299_v56 = vrot.slane %v1294_v48, %v4609_v31  ;;  %v1387_v57 = vcombine.high %v1379_v49, %v1379_v49  ;;  %v1306_v59 = vrot.slane %v1301_v51, %v4609_v31 }
  0x25   : > { %v4620_v46 = vcombine.low %v1512_v39, %v1519_v40  ;;  %v1313_v60 = vrot.slane %v1308_v52, %v4609_v31  ;;  %v1388_v61 = vcombine.high %v1386_v53, %v1386_v53  ;;  %v1390_v1 = vpack.i.b16 %v1379_v49, %v1379_v49 }
  0x26   : > { %1530 = vrot.lane.b32.xlu0 %v4623_v50, %s5622_s17  ;;  %v4637_v62 = vcombine.low %v1292_v55, %v1299_v56  ;;  %v1404_v63 = vpack.i.b16 %v1387_v57, %v1387_v57  ;;  %v1397_v2 = vpack.i.b16 %v1386_v53, %v1386_v53  ;;  %v1076_v6 = vrot.slane %v1062_v58, %v4601_v23 }
  0x27   : > { %1532 = vrot.lane.b32.xlu1 %v4620_v46, %s5622_s17  ;;  %v4639_v3 = vcombine.low %v1306_v59, %v1313_v60  ;;  %v1411_v4 = vpack.i.b16 %v1388_v61, %v1388_v61  ;;  %v1395_v9 = vrot.slane %v1390_v1, %v4609_v31  ;;  %v1166_v11 = vcombine.high %v4147_v7, %v4147_v7  ;;  %v4127_v1 = vld.sshfl [vmem:[%s5608_s7] sm:$0x33 pattern:$0x75316420] }
  0x28   : > { %v1409_v8 = vrot.slane %v1404_v63, %v4609_v31  ;;  %v1402_v10 = vrot.slane %v1397_v2, %v4609_v31  ;;  %v1077_v13 = vcombine.high %v1069_v5, %v1069_v5  ;;  %v1078_v14 = vcombine.high %v1076_v6, %v1076_v6 }
  0x29   : > { %v1416_v12 = vrot.slane %v1411_v4, %v4609_v31  ;;  %v1087_v17 = vpack.i.b16 %v1076_v6, %v1076_v6  ;;  %v1173_v18 = vrot.slane %v4147_v7, %v4601_v23  ;;  %v1180_v24 = vrot.slane %v1166_v11, %v4601_v23 }
  0x2a   : > { %4117 = vmatmul.mubr.msk.bf16.gmra.mxu0 %vm346_vm1, %v4379_v16  ;;  %4120 = vmatmul.mubr.msk.bf16.gmra.mxu1 %vm346_vm1, %v4379_v16  ;;  %v4654_v15 = vcombine.low %v1395_v9, %v1402_v10  ;;  %v1080_v16 = vpack.i.b16 %v1069_v5, %v1069_v5  ;;  %v1094_v21 = vpack.i.b16 %v1077_v13, %v1077_v13  ;;  %vm831_vm6 = vcmask 588800  }
  0x2b   : > { %544 = vmatprep.mubr.bf16.mxu0 %v5626_v0  ;;  %585 = vmatprep.mubr.bf16.mxu1 %v5626_v0  ;;  %v4657_v19 = vcombine.low %v1409_v8, %v1416_v12  ;;  %v1101_v22 = vpack.i.b16 %v1078_v14, %v1078_v14  ;;  %v1092_v27 = vrot.slane %v1087_v17, %v4609_v31  ;;  %v4131_v14 = vld.sshfl [vmem:[%s5608_s7 + $0x4] sm:$0x33 pattern:$0x75316420]  ;;  %vm1123_vm7 = vcmask 523264  }
  0x2c   : > { %1326 = vrot.lane.b32.xlu1 %v4639_v3, %s5653_s20  ;;  %1324 = vrot.lane.b32.xlu0 %v4637_v62, %s5653_s20  ;;  %v1085_v26 = vrot.slane %v1080_v16, %v4609_v31  ;;  %v1181_v28 = vcombine.high %v1173_v18, %v1173_v18  ;;  %v852_v29 = vcombine.high %v4135_v25, %v4135_v25  ;;  %vm1041_vm8 = vcmask 531456  }
  0x2d   : > { %v1099_v30 = vrot.slane %v1094_v21, %v4609_v31  ;;  %v1106_v32 = vrot.slane %v1101_v22, %v4609_v31  ;;  %v1182_v33 = vcombine.high %v1180_v24, %v1180_v24  ;;  %v1184_v36 = vpack.i.b16 %v1173_v18, %v1173_v18 }
  0x2e   : > { %v4671_v34 = vcombine.low %v1085_v26, %v1092_v27  ;;  %v1198_v35 = vpack.i.b16 %v1181_v28, %v1181_v28  ;;  %v1191_v37 = vpack.i.b16 %v1180_v24, %v1180_v24  ;;  %v859_v40 = vrot.slane %v4135_v25, %v4601_v23 }
  0x2f   : > { %v4673_v38 = vcombine.low %v1099_v30, %v1106_v32  ;;  %v1205_v39 = vpack.i.b16 %v1182_v33, %v1182_v33  ;;  %v866_v41 = vrot.slane %v852_v29, %v4601_v23  ;;  %v1189_v44 = vrot.slane %v1184_v36, %v4609_v31 }
  0x30   : > { %1429 = vrot.lane.b32.xlu1 %v4657_v19, %s5620_s23  ;;  %1427 = vrot.lane.b32.xlu0 %v4654_v15, %s5620_s23  ;;  %v1203_v43 = vrot.slane %v1198_v35, %v4609_v31  ;;  %v1196_v45 = vrot.slane %v1191_v37, %v4609_v31  ;;  %v957_v47 = vcombine.high %v4139_v42, %v4139_v42  ;;  %vm913_vm9 = vcmask 465920  }
  0x31   : > { %v1210_v48 = vrot.slane %v1205_v39, %v4609_v31  ;;  %v867_v49 = vcombine.high %v859_v40, %v859_v40  ;;  %v868_v51 = vcombine.high %v866_v41, %v866_v41  ;;  %v870_v53 = vpack.i.b16 %v859_v40, %v859_v40 }
  0x32   : > { %v4688_v52 = vcombine.low %v1189_v44, %v1196_v45  ;;  %v877_v54 = vpack.i.b16 %v866_v41, %v866_v41  ;;  %v964_v55 = vrot.slane %v4139_v42, %v4601_v23  ;;  %v971_v59 = vrot.slane %v957_v47, %v4601_v23 }
  0x33   : > { %v4691_v56 = vcombine.low %v1203_v43, %v1210_v48  ;;  %v884_v57 = vpack.i.b16 %v867_v49, %v867_v49  ;;  %v891_v58 = vpack.i.b16 %v868_v51, %v868_v51  ;;  %v875_v60 = vrot.slane %v870_v53, %v4609_v31 }
  0x34   : > { %1119 = vrot.lane.b32.xlu1 %v4673_v38, %s4449_s26  ;;  %1117 = vrot.lane.b32.xlu0 %v4671_v34, %s4449_s26  ;;  %v882_v61 = vrot.slane %v877_v54, %v4609_v31  ;;  %v972_v63 = vcombine.high %v964_v55, %v964_v55  ;;  %v973_v5 = vcombine.high %v971_v59, %v971_v59  ;;  %vm1018_vm10 = vcmask 515072  }
  0x35   : > { %v889_v2 = vrot.slane %v884_v57, %v4609_v31  ;;  %v896_v4 = vrot.slane %v891_v58, %v4609_v31  ;;  %v975_v8 = vpack.i.b16 %v964_v55, %v964_v55  ;;  %v982_v9 = vpack.i.b16 %v971_v59, %v971_v59 }
  0x36   : > { %v4705_v6 = vcombine.low %v875_v60, %v882_v61  ;;  %v989_v7 = vpack.i.b16 %v972_v63, %v972_v63  ;;  %v996_v11 = vpack.i.b16 %v973_v5, %v973_v5  ;;  %v641_v12 = vcombine.high %v4127_v1, %v4127_v1 }
  0x37   : > { %v4707_v10 = vcombine.low %v889_v2, %v896_v4  ;;  %v648_v13 = vrot.slane %v4127_v1, %v4601_v23  ;;  %v980_v17 = vrot.slane %v975_v8, %v4609_v31  ;;  %v987_v18 = vrot.slane %v982_v9, %v4609_v31 }
  0x38   : > { %1223 = vrot.lane.b32.xlu1 %v4691_v56, %s5624_s18  ;;  %1221 = vrot.lane.b32.xlu0 %v4688_v52, %s5624_s18  ;;  %v994_v16 = vrot.slane %v989_v7, %v4609_v31  ;;  %v747_v21 = vcombine.high %v4131_v14, %v4131_v14  ;;  %v1001_v22 = vrot.slane %v996_v11, %v4609_v31  ;;  %vm702_vm11 = vcmask 449536  }
  0x39   : > { %v655_v24 = vrot.slane %v641_v12, %v4601_v23  ;;  %v656_v25 = vcombine.high %v648_v13, %v648_v13  ;;  %v4722_v26 = vcombine.low %v980_v17, %v987_v18  ;;  %v659_v27 = vpack.i.b16 %v648_v13, %v648_v13 }
  0x3a   : > { %v754_v28 = vrot.slane %v4131_v14, %v4601_v23  ;;  %v761_v29 = vrot.slane %v747_v21, %v4601_v23  ;;  %v4726_v30 = vcombine.low %v994_v16, %v1001_v22  ;;  %vm5656_vm12 = vcmask 72704  }
  0x3b   : > { %v657_v32 = vcombine.high %v655_v24, %v655_v24  ;;  %v673_v33 = vpack.i.b16 %v656_v25, %v656_v25  ;;  %v666_v35 = vpack.i.b16 %v655_v24, %v655_v24  ;;  %v664_v36 = vrot.slane %v659_v27, %v4609_v31 }
  0x3c   : > { %909 = vrot.lane.b32.xlu1 %v4707_v10, %s4451_s22  ;;  %907 = vrot.lane.b32.xlu0 %v4705_v6, %s4451_s22  ;;  %v762_v37 = vcombine.high %v754_v28, %v754_v28  ;;  %v763_v39 = vcombine.high %v761_v29, %v761_v29  ;;  %v765_v40 = vpack.i.b16 %v754_v28, %v754_v28  ;;  %vm2086_vm13 = vcmask 56320  }
  0x3d   : > { %v678_v41 = vrot.slane %v673_v33, %v4609_v31  ;;  %v680_v42 = vpack.i.b16 %v657_v32, %v657_v32  ;;  %v671_v43 = vrot.slane %v666_v35, %v4609_v31  ;;  %v772_v48 = vpack.i.b16 %v761_v29, %v761_v29 }
  0x3e   : > { %v779_v44 = vpack.i.b16 %v762_v37, %v762_v37  ;;  %v786_v45 = vpack.i.b16 %v763_v39, %v763_v39  ;;  %v770_v47 = vrot.slane %v765_v40, %v4609_v31  ;;  %vm5655_vm14 = vcmask 64512  }
  0x3f   : > { %v685_v49 = vrot.slane %v680_v42, %v4609_v31  ;;  %v4128_v51 = vcombine.low %v664_v36, %v671_v43  ;;  %v777_v55 = vrot.slane %v772_v48, %v4609_v31  ;;  %vm2190_vm15 = vcmask 7168  }
  0x40   : > { %1014 = vrot.lane.b32.xlu1 %v4726_v30, %s4452_s24  ;;  %1012 = vrot.lane.b32.xlu0 %v4722_v26, %s4452_s24  ;;  %v784_v53 = vrot.slane %v779_v44, %v4609_v31  ;;  %v791_v54 = vrot.slane %v786_v45, %v4609_v31  ;;  %vm1959_vm0 = vcmask 982016   ;;  %vm808_vm1 = vcmask 457728  }
  0x41   : > { %v4129_v57 = vcombine.low %v678_v41, %v685_v49  ;;  %v4132_v58 = vcombine.low %v770_v47, %v777_v55 }
  0x42   : > { %v4133_v59 = vcombine.low %v784_v53, %v791_v54 }
  0x44   : > { %696 = vrot.lane.b32.xlu0 %v4128_v51, %s4453_s25  ;;  %698 = vrot.lane.b32.xlu1 %v4129_v57, %s4453_s25 }
  0x48   : > { %802 = vrot.lane.b32.xlu0 %v4132_v58, %s5610_s12  ;;  %804 = vrot.lane.b32.xlu1 %v4133_v59, %s5610_s12  ;;  %s5618_s12 = smov 1  }
  0x4c   : > { %2643 = vrot.lane.b32.xlu0 %v4623_v50, %s5612_s13  ;;  %2645 = vrot.lane.b32.xlu1 %v4620_v46, %s5612_s13  ;;  %s4459_s13 = smov 121  }
  0x50   : > { %2439 = vrot.lane.b32.xlu0 %v4637_v62, %s5614_s19  ;;  %2441 = vrot.lane.b32.xlu1 %v4639_v3, %s5614_s19  ;;  %s4460_s19 = smov 127  }
  0x54   : > { %2541 = vrot.lane.b32.xlu0 %v4654_v15, %s5616_s21  ;;  %2543 = vrot.lane.b32.xlu1 %v4657_v19, %s5616_s21  ;;  %s4461_s21 = smov 119  }
  0x58   : > { %2337 = vrot.lane.b32.xlu0 %v4688_v52, %s5618_s12  ;;  %2339 = vrot.lane.b32.xlu1 %v4691_v56, %s5618_s12  ;;  %s4462_s12 = smov 120  }
  0x5c   : > { %2057 = vrot.lane.b32.xlu0 %v4705_v6, %s4459_s13  ;;  %2059 = vrot.lane.b32.xlu1 %v4707_v10, %s4459_s13 }
  0x60   : > { %2161 = vrot.lane.b32.xlu0 %v4722_v26, %s4460_s19  ;;  %2163 = vrot.lane.b32.xlu1 %v4726_v30, %s4460_s19 }
  0x64   : > { %1849 = vrot.lane.b32.xlu0 %v4128_v51, %s4461_s21  ;;  %1851 = vrot.lane.b32.xlu1 %v4129_v57, %s4461_s21 }
  0x68   : > { %1953 = vrot.lane.b32.xlu0 %v4132_v58, %s4462_s12  ;;  %1955 = vrot.lane.b32.xlu1 %v4133_v59, %s4462_s12 }
  0x6c   : > { %3778 = vrot.lane.b32.xlu0 %v4623_v50, %s5622_s17  ;;  %3780 = vrot.lane.b32.xlu1 %v4620_v46, %s5622_s17  ;;  %s5664_s17 = smov 65  }
  0x70   : > { %3574 = vrot.lane.b32.xlu0 %v4637_v62, %s5653_s20  ;;  %3576 = vrot.lane.b32.xlu1 %v4639_v3, %s5653_s20 }
  0x74   : > { %3676 = vrot.lane.b32.xlu0 %v4654_v15, %s5620_s23  ;;  %3678 = vrot.lane.b32.xlu1 %v4657_v19, %s5620_s23  ;;  %s5662_s23 = smov 56  }
  0x78   : > { %3370 = vrot.lane.b32.xlu0 %v4671_v34, %s4449_s26  ;;  %3372 = vrot.lane.b32.xlu1 %v4673_v38, %s4449_s26 }
  0x7c   : > { %3472 = vrot.lane.b32.xlu0 %v4688_v52, %s5624_s18  ;;  %3474 = vrot.lane.b32.xlu1 %v4691_v56, %s5624_s18  ;;  %s5666_s18 = smov 73  }
  0x80   : > { %3166 = vrot.lane.b32.xlu0 %v4705_v6, %s4451_s22  ;;  %3168 = vrot.lane.b32.xlu1 %v4707_v10, %s4451_s22 }
  0x84   : > { %3268 = vrot.lane.b32.xlu0 %v4722_v26, %s4452_s24  ;;  %3270 = vrot.lane.b32.xlu1 %v4726_v30, %s4452_s24 }
  0x88   : > { %2962 = vrot.lane.b32.xlu0 %v4128_v51, %s4453_s25  ;;  %2964 = vrot.lane.b32.xlu1 %v4129_v57, %s4453_s25 }
  0x8c   : > { %3064 = vrot.lane.b32.xlu0 %v4132_v58, %s5662_s23  ;;  %3066 = vrot.lane.b32.xlu1 %v4133_v59, %s5662_s23 }
  0x91   : > { %v336_v46 = vpop.permute.xlu0 %335  ;;  %v331_v50 = vpop.permute.xlu1 %330 }
  0x95   : > { %v326_v3 = vpop.permute.xlu0 %325 }
  0x96   : > { %v4804_v62 = vpop.permute.xlu1 %492 }
  0x99   : > { %v4808_v19 = vpop.permute.xlu0 %1530 }
  0x9a   : > { %v4806_v15 = vpop.permute.xlu1 %1532 }
  0x9e   : > { %v4810_v34 = vpop.permute.xlu1 %1326  ;;  %v4812_v38 = vpop.permute.xlu0 %1324 }
  0xa2   : > { %v4814_v60 = vpop.permute.xlu1 %1429  ;;  %v4816_v61 = vpop.permute.xlu0 %1427 }
  0xa6   : > { %v4818_v5 = vpop.permute.xlu1 %1119  ;;  %v4820_v6 = vpop.permute.xlu0 %1117 }
  0xaa   : > { %v4822_v13 = vpop.permute.xlu1 %1223  ;;  %v4824_v14 = vpop.permute.xlu0 %1221 }
  0xae   : > { %v4826_v40 = vpop.permute.xlu1 %909  ;;  %v4828_v41 = vpop.permute.xlu0 %907 }
  0xe2   : > { %v400_v52 = vpop.f32.mrf.mxu0  ;;  %v451_v56 = vpop.f32.mrf.mxu1 }
  0xe3   : > { %v401_v42 = vadd.f32 %v400_v52, %v326_v3  ;;  %v452_v43 = vadd.f32 %v451_v56, %v326_v3  ;;  %v4836_v52 = vpop.permute.xlu0 %1012 }
  0xe4   : > { %v402_v63 = vpop.f32.mrf.mxu0  ;;  %v453_v1 = vpop.f32.mrf.mxu1 }
  0xe5   : > { %v403_v22 = vadd.f32 %v402_v63, %v326_v3  ;;  %v454_v24 = vadd.f32 %v453_v1, %v326_v3  ;;  %v4834_v3 = vpop.permute.xlu1 %1014  ;;  %v468_v56 = vmax.f32 %v401_v42, 0.0  ;;  %v470_v63 = vmax.f32 %v452_v43, 0.0 }
  0xe6   : > { %v404_v2 = vpop.f32.mrf.mxu0  ;;  %v455_v4 = vpop.f32.mrf.mxu1 }
  0xe7   : > { %v405_v27 = vadd.f32 %v404_v2, %v331_v50  ;;  %v456_v28 = vadd.f32 %v455_v4, %v331_v50  ;;  %v469_v49 = vmax.f32 %v403_v22, 0.0  ;;  %v471_v51 = vmax.f32 %v454_v24, 0.0  ;;  %v4838_v4 = vpop.permute.xlu0 %696  ;;  %v2374_v24 = vld [vmem:[#allocation2 + $0x14] sm:$0xf] }
  0xe8   : > { %v406_v7 = vpop.f32.mrf.mxu0  ;;  %v457_v8 = vpop.f32.mrf.mxu1 }
  0xe9   : > { %v407_v11 = vadd.f32 %v406_v7, %v331_v50  ;;  %v458_v12 = vadd.f32 %v457_v8, %v331_v50  ;;  %v472_v55 = vmax.f32 %v405_v27, 0.0  ;;  %v474_v57 = vmax.f32 %v456_v28, 0.0  ;;  %v480_v7 = vld [vmem:[%s5604_s3] sm:$0xf]  ;;  %v4843_v8 = vpop.permute.xlu1 %698 }
  0xea   : > { %v410_v9 = vpop.f32.mrf.mxu0  ;;  %v461_v10 = vpop.f32.mrf.mxu1 }
  0xeb   : > { %v411_v16 = vadd.f32 %v410_v9, %v336_v46  ;;  %v462_v17 = vadd.f32 %v461_v10, %v336_v46  ;;  %v473_v35 = vmax.f32 %v407_v11, 0.0  ;;  %v475_v36 = vmax.f32 %v458_v12, 0.0  ;;  %v4845_v9 = vpop.permute.xlu0 %802 }
  0xec   : > { %v412_v18 = vpop.f32.mrf.mxu0  ;;  %v463_v21 = vpop.f32.mrf.mxu1  ;;  %v481_v1 = vpack.c.bf16 %v472_v55, %v468_v56  ;;  %v483_v2 = vpack.c.bf16 %v474_v57, %v470_v63 }
  0xed   : > { %v413_v25 = vadd.f32 %v412_v18, %v336_v46  ;;  %v464_v26 = vadd.f32 %v463_v21, %v336_v46  ;;  %v476_v29 = vmax.f32 %v411_v16, 0.0  ;;  %v478_v30 = vmax.f32 %v462_v17, 0.0  ;;  %v4849_v10 = vpop.permute.xlu1 %804  ;;  %v2578_v16 = vld [vmem:[#allocation2 + $0x14] sm:$0xf] }
  0xee   : > { %v414_v32 = vpop.f32.mrf.mxu0  ;;  %v465_v33 = vpop.f32.mrf.mxu1  ;;  %v482_v58 = vpack.c.bf16 %v473_v35, %v469_v49  ;;  %v484_v59 = vpack.c.bf16 %v475_v36, %v471_v51  ;;  %v2272_v36 = vld [vmem:[#allocation2 + $0x14] sm:$0xf] }
  0xef   : > { %v477_v37 = vmax.f32 %v413_v25, 0.0  ;;  %v479_v39 = vmax.f32 %v464_v26, 0.0  ;;  %v485_v44 = vpack.c.bf16 %v476_v29, %v476_v29  ;;  %v487_v45 = vpack.c.bf16 %v478_v30, %v478_v30  ;;  %v4851_v11 = vpop.permute.xlu0 %2643  ;;  %v2476_v29 = vld [vmem:[#allocation2 + $0x14] sm:$0xf] }
  0xf0   : > { %v415_v47 = vpop.f32.mrf.mxu0  ;;  %v466_v48 = vpop.f32.mrf.mxu1 }
  0xf1   : > { %v486_v53 = vpack.c.bf16 %v477_v37, %v477_v37  ;;  %v488_v54 = vpack.c.bf16 %v479_v39, %v479_v39  ;;  %v501_v46 = vsel %vm499_vm2, %v485_v44, 0  ;;  %v507_v50 = vsel %vm499_vm2, %v487_v45, 0  ;;  %v4853_v12 = vpop.permute.xlu1 %2645 }
  0xf2   : > { %v5631_v17 = vrot.slane %v4853_v12, 4 }
  0xf3   : > { %4121 = vmatprep.subr.msk.bf16.mxu0 %vm499_vm2, %v486_v53  ;;  %4123 = vmatprep.subr.msk.bf16.mxu1 %vm499_vm2, %v488_v54  ;;  %v4856_v18 = vpop.permute.xlu0 %2439  ;;  %v3713_v54 = vld [vmem:[#allocation2 + $0x14] sm:$0xf] }
  0xf4   : > { %525 = vmatpush1.bf16.msra.mxu0 %v501_v46  ;;  %566 = vmatpush1.bf16.msra.mxu1 %v507_v50  ;;  %v2657_v21 = vmul.bf16 %v5631_v17, %v2578_v16  ;;  %v3509_v46 = vld [vmem:[#allocation2 + $0x14] sm:$0xf] }
  0xf5   : > { %526 = vmatprep.subr.bf16.mxu0 %v482_v58  ;;  %567 = vmatprep.subr.bf16.mxu1 %v484_v59  ;;  %v4860_v22 = vpop.permute.xlu1 %2441 }
  0xf6   : > { %v5630_v25 = vrot.slane %v4860_v22, 4  ;;  %2665 = vrot.lane.b32.xlu1 %v2657_v21, %s4461_s21 }
  0xf7   : > { %v4864_v26 = vpop.permute.xlu0 %2541 }
  0xf8   : > { %527 = vmatpush1.bf16.msra.mxu0 %v481_v1  ;;  %568 = vmatpush1.bf16.msra.mxu1 %v483_v2  ;;  %v2453_v27 = vmul.bf16 %v5630_v25, %v2374_v24  ;;  %v3611_v2 = vld [vmem:[#allocation2 + $0x14] sm:$0xf] }
  0xf9   : > { %v4868_v28 = vpop.permute.xlu1 %2543 }
  0xfa   : > { %v5632_v30 = vrot.slane %v4868_v28, 4  ;;  %2461 = vrot.lane.b32.xlu0 %v2453_v27, %s4459_s13 }
  0xfb   : > { %4122 = vmatmul.mubr.msk.bf16.vlgmr.msra.gmra.mxu0 %vm495_vm3, %v480_v7  ;;  %4124 = vmatmul.mubr.msk.bf16.vlgmr.msra.gmra.mxu1 %vm495_vm3, %v480_v7  ;;  %v4872_v32 = vpop.permute.xlu0 %2337  ;;  %vm2063_vm3 = vcmask 990208  }
  0xfc   : > { %1722 = vmatprep.mubr.bf16.mxu0 %v5626_v0  ;;  %1763 = vmatprep.mubr.bf16.mxu1 %v5626_v0  ;;  %v2555_v33 = vmul.bf16 %v5632_v30, %v2476_v29  ;;  %v3305_v29 = vld [vmem:[#allocation2 + $0x14] sm:$0xf] }
  0xfd   : > { %v4876_v35 = vpop.permute.xlu1 %2339 }
  0xfe   : > { %v5628_v37 = vrot.slane %v4876_v35, 4  ;;  %2563 = vrot.lane.b32.xlu1 %v2555_v33, %s4462_s12 }
  0xff   : > { %v4880_v39 = vpop.permute.xlu0 %2057 }
 0x100   : > { %v2351_v42 = vmul.bf16 %v5628_v37, %v2272_v36 }
 0x101   : > { %v4884_v43 = vpop.permute.xlu1 %2059 }
 0x102   : > { %2359 = vrot.lane.b32.xlu0 %v2351_v42, %s4460_s19 }
 0x103   : > { %v4887_v44 = vpop.permute.xlu0 %2161 }
 0x105   : > { %v4889_v45 = vpop.permute.xlu1 %2163 }
 0x107   : > { %v4891_v47 = vpop.permute.xlu0 %1849 }
 0x109   : > { %v4893_v48 = vpop.permute.xlu1 %1851 }
 0x10b   : > { %v4895_v49 = vpop.permute.xlu0 %1953 }
 0x10d   : > { %v4897_v51 = vpop.permute.xlu1 %1955 }
 0x10f   : > { %v4899_v53 = vpop.permute.xlu0 %3778 }
 0x110   : > { %v5629_v21 = vrot.slane %v4899_v53, 4 }
 0x111   : > { %v3781_v55 = vpop.permute.xlu1 %3780 }
 0x112   : > { %v3783_v57 = vrot.slane %v3781_v55, 4 }
 0x113   : > { %v4901_v58 = vpop.permute.xlu0 %3574 }
 0x114   : > { %v3792_v59 = vmul.bf16 %v3783_v57, %v3713_v54  ;;  %v3785_v42 = vsel %vm499_vm2, %v5629_v21, %v3783_v57  ;;  %v5633_v54 = vrot.slane %v4901_v58, 4 }
 0x115   : > { %v3577_v50 = vpop.permute.xlu1 %3576 }
 0x116   : > { %v3579_v56 = vrot.slane %v3577_v50, 4  ;;  %3800 = vrot.lane.b32.xlu1 %v3792_v59, %s4453_s25 }
 0x117   : > { %v4904_v63 = vpop.permute.xlu0 %3676 }
 0x118   : > { %v3588_v1 = vmul.bf16 %v3579_v56, %v3509_v46  ;;  %v3407_v46 = vld [vmem:[#allocation2 + $0x14] sm:$0xf]  ;;  %v5634_v57 = vrot.slane %v4904_v63, 4 }
 0x119   : > { %v3679_v7 = vpop.permute.xlu1 %3678 }
 0x11a   : > { %v3681_v16 = vrot.slane %v3679_v7, 4  ;;  %3596 = vrot.lane.b32.xlu0 %v3588_v1, %s4451_s22 }
 0x11b   : > { %v4908_v24 = vpop.permute.xlu0 %3370 }
 0x11c   : > { %v3690_v27 = vmul.bf16 %v3681_v16, %v3611_v2  ;;  %v4919_v2 = vsel %vm726_vm4, %v3785_v42, %v3781_v55  ;;  %v3683_v55 = vsel %vm499_vm2, %v5634_v57, %v3681_v16  ;;  %v5636_v42 = vrot.slane %v4908_v24, 4 }
 0x11d   : > { %v3373_v33 = vpop.permute.xlu1 %3372 }
 0x11e   : > { %v3375_v36 = vrot.slane %v3373_v33, 4  ;;  %3698 = vrot.lane.b32.xlu1 %v3690_v27, %s5662_s23  ;;  %v3581_v27 = vsel %vm499_vm2, %v5633_v54, %v3579_v56  ;;  %v3203_v54 = vld [vmem:[#allocation2 + $0x14] sm:$0xf] }
 0x11f   : > { %v4915_v0 = vpop.permute.xlu0 %3472  ;;  %v4927_v30 = vsel %vm936_vm5, %v3581_v27, %v3577_v50 }
 0x120   : > { %v3384_v59 = vmul.bf16 %v3375_v36, %v3305_v29  ;;  %v3101_v29 = vld [vmem:[#allocation2 + $0x14] sm:$0xf]  ;;  %v3377_v50 = vsel %vm499_vm2, %v5636_v42, %v3375_v36 }
 0x121   : > { %v3475_v1 = vpop.permute.xlu1 %3474 }
 0x122   : > { %v3477_v37 = vrot.slane %v3475_v1, 4  ;;  %3392 = vrot.lane.b32.xlu0 %v3384_v59, %s4449_s26 }
 0x123   : > { %v4933_v59 = vpop.permute.xlu0 %3166 }
 0x124   : > { %v3486_v21 = vmul.bf16 %v3477_v37, %v3407_v46  ;;  %v4937_v46 = vsel %vm831_vm6, %v3683_v55, %v3679_v7  ;;  %v5638_v55 = vrot.slane %v4933_v59, 4 }
 0x125   : > { %v3169_v25 = vpop.permute.xlu1 %3168 }
 0x126   : > { %v3171_v17 = vrot.slane %v3169_v25, 4  ;;  %3494 = vrot.lane.b32.xlu1 %v3486_v21, %s4452_s24  ;;  %v5637_v21 = vrot.slane %v4915_v0, 4 }
 0x127   : > { %v4943_v57 = vpop.permute.xlu0 %3268 }
 0x128   : > { %v3180_v56 = vmul.bf16 %v3171_v17, %v3101_v29  ;;  %5663 = vst [vmem:[#allocation10_spill] sm:$0xff] %v4943_v57  ;;  %v4946_v29 = vsel %vm1123_vm7, %v3377_v50, %v3373_v33  ;;  %v3479_v7 = vsel %vm499_vm2, %v5637_v21, %v3477_v37 }
 0x129   : > { %v3271_v27 = vpop.permute.xlu1 %3270  ;;  %v4954_v36 = vsel %vm1041_vm8, %v3479_v7, %v3475_v1  ;;  %v2897_v1 = vld [vmem:[#allocation2 + $0x14] sm:$0xf] }
 0x12a   : > { %3188 = vrot.lane.b32.xlu0 %v3180_v56, %s5653_s20  ;;  %v3273_v16 = vrot.slane %v3271_v27, 4  ;;  %v3173_v56 = vsel %vm499_vm2, %v5638_v55, %v3171_v17 }
 0x12b   : > { %v4960_v50 = vpop.permute.xlu0 %2962  ;;  %v4964_v21 = vsel %vm913_vm9, %v3173_v56, %v3169_v25 }
 0x12c   : > { %v3282_v20 = vmul.bf16 %v3273_v16, %v3203_v54  ;;  %v5641_v54 = vrot.slane %v4943_v57, 4  ;;  %5665 = vst [vmem:[#allocation11_spill] sm:$0xff] %v4960_v50  ;;  %v5642_v37 = vrot.slane %v4960_v50, 4 }
 0x12d   : > { %v2965_v33 = vpop.permute.xlu1 %2964 }
 0x12e   : > { %3290 = vrot.lane.b32.xlu1 %v3282_v20, %s5664_s17  ;;  %v2967_v42 = vrot.slane %v2965_v33, 4  ;;  %v3275_v20 = vsel %vm499_vm2, %v5641_v54, %v3273_v16  ;;  %v5649_v54 = vrot.slane %v4864_v26, 4 }
 0x12f   : > { %v4974_v55 = vsel %vm1018_vm10, %v3275_v20, %v3271_v27 }
 0x130   : > { %v2976_v7 = vmul.bf16 %v2967_v42, %v2897_v1  ;;  %v2969_v17 = vsel %vm499_vm2, %v5642_v37, %v2967_v42  ;;  %5667 = vst [vmem:[#allocation12_spill] sm:$0xff] %v4974_v55  ;;  %v5669_v42 = vrot.slane %v4868_v28, 4 }
 0x131   : > { %v4977_v25 = vsel %vm702_vm11, %v2969_v17, %v2965_v33 }
 0x132   : > { %2984 = vrot.lane.b32.xlu0 %v2976_v7, %s5666_s18  ;;  %5668 = vst [vmem:[#allocation13_spill] sm:$0xff] %v4977_v25 }
 0x1bb   : > { %v546_v56 = vpop.f32.mrf.mxu0  ;;  %v587_v31 = vpop.f32.mrf.mxu1 }
 0x1bc   : > { %v547_v7 = vadd.f32 %v546_v56, %v4804_v62  ;;  %v588_v27 = vadd.f32 %v587_v31, %v4804_v62  ;;  %v2548_v56 = vsel %vm499_vm2, %v5649_v54, %v5669_v42 }
 0x1bd   : > { %v548_v37 = vpop.f32.mrf.mxu0  ;;  %v589_v23 = vpop.f32.mrf.mxu1 }
 0x1be   : > { %v549_v20 = vadd.f32 %v548_v37, %v4804_v62  ;;  %v590_v33 = vadd.f32 %v589_v23, %v4804_v62  ;;  %v5670_v37 = vrot.slane %v4853_v12, 4  ;;  %v5671_v23 = vrot.slane %v4851_v11, 4 }
 0x1bf   : > { %v550_v17 = vpop.f32.mrf.mxu0  ;;  %v591_v50 = vpop.f32.mrf.mxu1 }
 0x1c0   : > { %v4987_v16 = vpack.c.bf16 %v549_v20, %v547_v7  ;;  %v4989_v1 = vpack.c.bf16 %v590_v33, %v588_v27  ;;  %v2650_v62 = vsel %vm499_vm2, %v5671_v23, %v5670_v37  ;;  %v5672_v50 = vrot.slane %v4860_v22, 4 }
 0x1c1   : > { %v551_v31 = vpop.f32.mrf.mxu0  ;;  %v592_v57 = vpop.f32.mrf.mxu1  ;;  %v5673_v7 = vrot.slane %v4856_v18, 4  ;;  %v5674_v20 = vrot.slane %v4876_v35, 4  ;;  %v5675_v33 = vrot.slane %v4872_v32, 4  ;;  %v1534_v17 = vrot.slane %v4808_v19, 4 }
 0x1c2   : > { %612 = vst [vmem:[#allocation2 + $0x4] sm:$0xff] %v4987_v16  ;;  %613 = vst [vmem:[#allocation2 + $0xc] sm:$0xff] %v4989_v1  ;;  %v1535_v57 = vrot.slane %v4806_v15, 4  ;;  %v5017_v31 = vsel %vm5656_vm12, %v2650_v62, %v4853_v12  ;;  %v5025_v23 = vsel %vm5655_vm14, %v2548_v56, %v4868_v28 }
 0x1c3   : > { %v2446_v27 = vsel %vm499_vm2, %v5673_v7, %v5672_v50  ;;  %v2344_v42 = vsel %vm499_vm2, %v5675_v33, %v5674_v20  ;;  %v1329_v33 = vrot.slane %v4810_v34, 4  ;;  %v1328_v20 = vrot.slane %v4812_v38, 4 }
 0x1c4   : > { %v5021_v37 = vsel %vm2086_vm13, %v2446_v27, %v4860_v22  ;;  %v5035_v12 = vsel %vm2190_vm15, %v2344_v42, %v4876_v35  ;;  %v1537_v28 = vsel %vm499_vm2, %v1534_v17, %v1535_v57  ;;  %v1536_v27 = vsel %vm726_vm4, %v1534_v17, %v4808_v19 }
 0x1c5   : > { %v1538_v35 = vsel %vm726_vm4, %v1537_v28, %v4806_v15  ;;  %v5652_v42 = vrot.slane %v4897_v51, 4  ;;  %v1957_v7 = vrot.slane %v4895_v49, 4  ;;  %v1330_v19 = vsel %vm936_vm5, %v1328_v20, %v4812_v38 }
 0x1c6   : > { %v1432_v17 = vrot.slane %v4814_v60, 4  ;;  %v1431_v15 = vrot.slane %v4816_v61, 4 }
 0x1c7   : > { %v1961_v28 = vsel %vm499_vm2, %v1957_v7, %v5652_v42 }
 0x1c8   : > { %v5089_v25 = vsel %vm1959_vm0, %v1961_v28, %v4897_v51  ;;  %v1122_v28 = vrot.slane %v4818_v5, 4 }
 0x1c9   : > { %v5056_v22 = vld [vmem:[#allocation2] sm:$0xff]  ;;  %v5058_v62 = vld [vmem:[#allocation2 + $0x8] sm:$0xff]  ;;  %v1464_v54 = vld [vmem:[#allocation2 + $0x10] sm:$0xf] }
 0x1ca   : > { %v1543_v56 = vmul.bf16 %v1538_v35, %v5058_v62  ;;  %v1542_v50 = vmul.bf16 %v5056_v22, %v1536_v27  ;;  %v1544_v27 = vmul.bf16 %v1535_v57, %v1464_v54  ;;  %v1336_v35 = vmul.bf16 %v5056_v22, %v1330_v19 }
 0x1cb   : > { %v1434_v54 = vsel %vm499_vm2, %v1431_v15, %v1432_v17  ;;  %v1967_v57 = vmul.bf16 %v5089_v25, %v5058_v62 }
 0x1cc   : > { %1550 = vrot.lane.b32.xlu1 %v1543_v56, %s4453_s25  ;;  %1548 = vrot.lane.b32.xlu0 %v1542_v50, %s4453_s25  ;;  %v1331_v56 = vsel %vm499_vm2, %v1328_v20, %v1329_v33  ;;  %v1258_v50 = vld [vmem:[#allocation2 + $0x10] sm:$0xf]  ;;  %v1433_v20 = vsel %vm831_vm6, %v1431_v15, %v4816_v61  ;;  %v1435_v19 = vsel %vm831_vm6, %v1434_v54, %v4814_v60  ;;  %v1226_v61 = vrot.slane %v4822_v13, 4 }
 0x1cd   : > { %v1332_v38 = vsel %vm936_vm5, %v1331_v56, %v4810_v34  ;;  %v1338_v42 = vmul.bf16 %v1329_v33, %v1258_v50  ;;  %v1121_v34 = vrot.slane %v4820_v6, 4  ;;  %v1439_v33 = vmul.bf16 %v5056_v22, %v1433_v20  ;;  %v1051_v50 = vld [vmem:[#allocation2 + $0x10] sm:$0xf] }
 0x1ce   : > { %v1337_v55 = vmul.bf16 %v5058_v62, %v1332_v38  ;;  %v1132_v54 = vmul.bf16 %v1122_v28, %v1051_v50 }
 0x1cf   : > { %v1125_v56 = vsel %vm499_vm2, %v1121_v34, %v1122_v28 }
 0x1d0   : > { %1552 = vrot.lane.b32.xlu0 %v1544_v27, %s4453_s25  ;;  %1342 = vrot.lane.b32.xlu1 %v1336_v35, %s4451_s22  ;;  %v1440_v27 = vmul.bf16 %v5058_v62, %v1435_v19  ;;  %v1124_v35 = vsel %vm1123_vm7, %v1121_v34, %v4820_v6  ;;  %v1126_v6 = vsel %vm1123_vm7, %v1125_v56, %v4818_v5  ;;  %v911_v34 = vrot.slane %v4828_v41, 4 }
 0x1d1   : > { %v1130_v60 = vmul.bf16 %v5056_v22, %v1124_v35  ;;  %v1131_v38 = vmul.bf16 %v5058_v62, %v1126_v6  ;;  %v1155_v35 = vld [vmem:[#allocation2 + $0x10] sm:$0xf] }
 0x1d4   : > { %1344 = vrot.lane.b32.xlu0 %v1337_v55, %s4451_s22  ;;  %1346 = vrot.lane.b32.xlu1 %v1338_v42, %s4451_s22  ;;  %v1361_v55 = vld [vmem:[#allocation2 + $0x10] sm:$0xf]  ;;  %v1225_v42 = vrot.slane %v4824_v14, 4 }
 0x1d5   : > { %v1441_v15 = vmul.bf16 %v1432_v17, %v1361_v55  ;;  %v1016_v55 = vrot.slane %v4836_v52, 4 }
 0x1d6   : > { %v1228_v20 = vsel %vm499_vm2, %v1225_v42, %v1226_v61  ;;  %v1227_v17 = vsel %vm1041_vm8, %v1225_v42, %v4824_v14  ;;  %v1017_v14 = vrot.slane %v4834_v3, 4  ;;  %v1235_v42 = vmul.bf16 %v1226_v61, %v1155_v35 }
 0x1d7   : > { %v1229_v19 = vsel %vm1041_vm8, %v1228_v20, %v4822_v13  ;;  %v1233_v5 = vmul.bf16 %v5056_v22, %v1227_v17  ;;  %v1019_v61 = vsel %vm1018_vm10, %v1016_v55, %v4836_v52  ;;  %v701_v20 = vrot.slane %v4843_v8, 4 }
 0x1d8   : > { %1445 = vrot.lane.b32.xlu0 %v1439_v33, %s5662_s23  ;;  %1447 = vrot.lane.b32.xlu1 %v1440_v27, %s5662_s23  ;;  %v912_v33 = vrot.slane %v4826_v40, 4  ;;  %v1234_v28 = vmul.bf16 %v5058_v62, %v1229_v19  ;;  %v914_v27 = vsel %vm913_vm9, %v911_v34, %v4828_v41  ;;  %v1020_v6 = vsel %vm499_vm2, %v1016_v55, %v1017_v14  ;;  %v946_v19 = vld [vmem:[#allocation2 + $0x10] sm:$0xf] }
 0x1d9   : > { %v920_v13 = vmul.bf16 %v5056_v22, %v914_v27  ;;  %v806_v52 = vrot.slane %v4845_v9, 4  ;;  %v631_v27 = vld [vmem:[#allocation2 + $0x10] sm:$0xf] }
 0x1da   : > { %v712_v55 = vmul.bf16 %v701_v20, %v631_v27 }
 0x1dc   : > { %1449 = vrot.lane.b32.xlu0 %v1441_v15, %s5662_s23  ;;  %1136 = vrot.lane.b32.xlu1 %v1130_v60, %s4449_s26  ;;  %v915_v15 = vsel %vm499_vm2, %v911_v34, %v912_v33  ;;  %v841_v60 = vld [vmem:[#allocation2 + $0x10] sm:$0xf] }
 0x1dd   : > { %v916_v41 = vsel %vm913_vm9, %v915_v15, %v4826_v40  ;;  %v922_v50 = vmul.bf16 %v912_v33, %v841_v60  ;;  %v1025_v40 = vmul.bf16 %v5056_v22, %v1019_v61  ;;  %v807_v33 = vrot.slane %v4849_v10, 4 }
 0x1de   : > { %v921_v56 = vmul.bf16 %v5058_v62, %v916_v41  ;;  %v5676_v60 = vrot.slane %v4851_v11, 4 }
 0x1e0   : > { %1138 = vrot.lane.b32.xlu0 %v1131_v38, %s4449_s26  ;;  %1140 = vrot.lane.b32.xlu1 %v1132_v54, %s4449_s26  ;;  %v700_v38 = vrot.slane %v4838_v4, 4  ;;  %v1021_v54 = vsel %vm1018_vm10, %v1020_v6, %v4834_v3  ;;  %v2649_v41 = vsel %vm5656_vm12, %v5676_v60, %v4851_v11  ;;  %v5679_v11 = vrot.slane %v4864_v26, 4  ;;  %v1784_v60 = vld [vmem:[#allocation2 + $0x10] sm:$0xf] }
 0x1e1   : > { %v1026_v17 = vmul.bf16 %v5058_v62, %v1021_v54  ;;  %v5681_v54 = vmul.bf16 %v4989_v1, %v5021_v37  ;;  %vm1855_vm12 = vcmask 973824  }
 0x1e2   : > { %v703_v34 = vsel %vm702_vm11, %v700_v38, %v4838_v4  ;;  %v2547_v61 = vsel %vm5655_vm14, %v5679_v11, %v4864_v26  ;;  %v2061_v26 = vrot.slane %v4880_v39, 4  ;;  %vm2167_vm14 = vcmask 1039360  }
 0x1e3   : > { %v710_v3 = vmul.bf16 %v5056_v22, %v703_v34  ;;  %v5683_v34 = vmul.bf16 %v4989_v1, %v5025_v23 }
 0x1e4   : > { %1239 = vrot.lane.b32.xlu0 %v1233_v5, %s4452_s24  ;;  %1241 = vrot.lane.b32.xlu1 %v1234_v28, %s4452_s24  ;;  %v1027_v5 = vmul.bf16 %v1017_v14, %v946_v19  ;;  %v705_v28 = vsel %vm499_vm2, %v700_v38, %v701_v20  ;;  %v809_v14 = vsel %vm808_vm1, %v806_v52, %v4845_v9 }
 0x1e5   : > { %v706_v4 = vsel %vm702_vm11, %v705_v28, %v4843_v8  ;;  %v815_v15 = vmul.bf16 %v5056_v22, %v809_v14  ;;  %v5680_v38 = vmul.bf16 %v4989_v1, %v5017_v31  ;;  %v5682_v31 = vrot.slane %v4872_v32, 4 }
 0x1e6   : > { %v711_v35 = vmul.bf16 %v5058_v62, %v706_v4  ;;  %v2064_v37 = vsel %vm2063_vm3, %v2061_v26, %v4880_v39  ;;  %v5684_v19 = vmul.bf16 %v4989_v1, %v5035_v12 }
 0x1e8   : > { %1243 = vrot.lane.b32.xlu0 %v1235_v42, %s4452_s24  ;;  %926 = vrot.lane.b32.xlu1 %v920_v13, %s5653_s20  ;;  %v810_v42 = vsel %vm499_vm2, %v806_v52, %v807_v33 }
 0x1e9   : > { %v811_v13 = vsel %vm808_vm1, %v810_v42, %v4849_v10  ;;  %v5678_v10 = vrot.slane %v4856_v18, 4 }
 0x1ea   : > { %v816_v8 = vmul.bf16 %v5058_v62, %v811_v13 }
 0x1eb   : > { %v2445_v6 = vsel %vm2086_vm13, %v5678_v10, %v4856_v18  ;;  %v2062_v18 = vrot.slane %v4884_v43, 4 }
 0x1ec   : > { %928 = vrot.lane.b32.xlu0 %v921_v56, %s5653_s20  ;;  %930 = vrot.lane.b32.xlu1 %v922_v50, %s5653_s20  ;;  %v736_v56 = vld [vmem:[#allocation2 + $0x10] sm:$0xf]  ;;  %s5677_s20 = smov 72   ;;  %v2655_v50 = vmul.bf16 %v4987_v16, %v2649_v41  ;;  %v2451_v20 = vmul.bf16 %v4987_v16, %v2445_v6  ;;  %v5261_v6 = vpop.permute.xlu1 %3066 }
 0x1ed   : > { %v817_v9 = vmul.bf16 %v807_v33, %v736_v56  ;;  %v2065_v52 = vsel %vm499_vm2, %v2061_v26, %v2062_v18  ;;  %v2166_v33 = vrot.slane %v4889_v45, 4  ;;  %v5694_v26 = vmul.bf16 %v4989_v1, %v4927_v30 }
 0x1ee   : > { %v2066_v23 = vsel %vm2063_vm3, %v2065_v52, %v4884_v43  ;;  %v1854_v43 = vrot.slane %v4893_v48, 4  ;;  %v5697_v52 = vmul.bf16 %v4989_v1, %v4937_v46 }
 0x1ef   : > { %v2071_v27 = vmul.bf16 %v2066_v23, %v5058_v62  ;;  %v5700_v23 = vld [vmem:[#allocation10_spill] sm:$0xff] }
 0x1f0   : > { %1031 = vrot.lane.b32.xlu0 %v1025_v40, %s5664_s17  ;;  %1033 = vrot.lane.b32.xlu1 %v1026_v17, %s5664_s17  ;;  %v2553_v40 = vmul.bf16 %v4987_v16, %v2547_v61  ;;  %v2343_v17 = vsel %vm2190_vm15, %v5682_v31, %v4872_v32  ;;  %v2070_v32 = vmul.bf16 %v2064_v37, %v5056_v22  ;;  %v1888_v61 = vld [vmem:[#allocation2 + $0x10] sm:$0xf] }
 0x1f1   : > { %v2349_v39 = vmul.bf16 %v4987_v16, %v2343_v17  ;;  %v1864_v56 = vmul.bf16 %v1854_v43, %v1784_v60 }
 0x1f4   : > { %1035 = vrot.lane.b32.xlu0 %v1027_v5, %s5664_s17  ;;  %716 = vrot.lane.b32.xlu1 %v710_v3, %s5666_s18  ;;  %v2165_v5 = vrot.slane %v4887_v44, 4  ;;  %v1992_v3 = vld [vmem:[#allocation2 + $0x10] sm:$0xf] }
 0x1f5   : > { %v2072_v28 = vmul.bf16 %v2062_v18, %v1992_v3  ;;  %v5693_v18 = vmul.bf16 %v4989_v1, %v4919_v2  ;;  %v5695_v2 = vrot.slane %v4908_v24, 4 }
 0x1f6   : > { %v2169_v12 = vsel %vm499_vm2, %v2165_v5, %v2166_v33  ;;  %v2168_v4 = vsel %vm2167_vm14, %v2165_v5, %v4887_v44  ;;  %v2096_v44 = vld [vmem:[#allocation2 + $0x10] sm:$0xf] }
 0x1f7   : > { %v2174_v42 = vmul.bf16 %v2168_v4, %v5056_v22  ;;  %v3376_v30 = vsel %vm1123_vm7, %v5695_v2, %v4908_v24  ;;  %v5704_v4 = vmul.bf16 %v4989_v1, %v4964_v21  ;;  %v5705_v21 = vld [vmem:[#allocation11_spill] sm:$0xff] }
 0x1f8   : > { %718 = vrot.lane.b32.xlu0 %v711_v35, %s5666_s18  ;;  %720 = vrot.lane.b32.xlu1 %v712_v55, %s5666_s18  ;;  %v1853_v35 = vrot.slane %v4891_v47, 4  ;;  %v2170_v55 = vsel %vm2167_vm14, %v2169_v12, %v4889_v45  ;;  %v2176_v45 = vmul.bf16 %v2166_v33, %v2096_v44  ;;  %v5698_v33 = vmul.bf16 %v4989_v1, %v4946_v29 }
 0x1f9   : > { %v2175_v14 = vmul.bf16 %v2170_v55, %v5058_v62  ;;  %v5699_v29 = vrot.slane %v4933_v59, 4  ;;  %v5701_v12 = vrot.slane %v5700_v23, 4  ;;  %v3069_v44 = vrot.slane %v5261_v6, 4 }
 0x1fa   : > { %v1856_v13 = vsel %vm1855_vm12, %v1853_v35, %v4891_v47 }
 0x1fb   : > { %v3172_v3 = vsel %vm913_vm9, %v5699_v29, %v4933_v59 }
 0x1fc   : > { %821 = vrot.lane.b32.xlu0 %v815_v15, %s5677_s20  ;;  %823 = vrot.lane.b32.xlu1 %v816_v8, %s5677_s20  ;;  %v1857_v15 = vsel %vm499_vm2, %v1853_v35, %v1854_v43  ;;  %v1862_v8 = vmul.bf16 %v1856_v13, %v5056_v22  ;;  %v3178_v35 = vmul.bf16 %v4987_v16, %v3172_v3 }
 0x1fd   : > { %v1858_v41 = vsel %vm1855_vm12, %v1857_v15, %v4893_v48  ;;  %v5688_v48 = vrot.slane %v4899_v53, 4  ;;  %v5706_v15 = vrot.slane %v5705_v21, 4 }
 0x1fe   : > { %v1863_v47 = vmul.bf16 %v1858_v41, %v5058_v62  ;;  %v5692_v62 = vrot.slane %v4904_v63, 4 }
 0x1ff   : > { %v3784_v11 = vsel %vm726_vm4, %v5688_v48, %v4899_v53 }
 0x200   : > { %825 = vrot.lane.b32.xlu0 %v817_v9, %s5677_s20  ;;  %2661 = vrot.lane.b32.xlu1 %v2655_v50, %s4461_s21  ;;  %v1960_v9 = vsel %vm1959_vm0, %v1957_v7, %v4895_v49  ;;  %v5256_v50 = vpop.permute.xlu0 %3064  ;;  %v3790_v49 = vmul.bf16 %v4987_v16, %v3784_v11  ;;  %v5690_v7 = vrot.slane %v4897_v51, 4  ;;  %v3682_v51 = vsel %vm831_vm6, %v5692_v62, %v4904_v63  ;;  %v5707_v11 = vld [vmem:[#allocation12_spill] sm:$0xff] }
 0x201   : > { %v1966_v10 = vmul.bf16 %v1960_v9, %v5056_v22 }
 0x202   : > { %v1968_v22 = vmul.bf16 %v5690_v7, %v1888_v61  ;;  %v5708_v61 = vmul.bf16 %v4989_v1, %v5707_v11 }
 0x204   : > { %2663 = vrot.lane.b32.xlu0 %v5680_v38, %s4461_s21  ;;  %2459 = vrot.lane.b32.xlu1 %v5681_v54, %s4459_s13  ;;  %v5267_v38 = vpop.permute.xlu0 %2461  ;;  %s5689_s21 = smov 8   ;;  %v5277_v54 = vpop.permute.xlu1 %2665 }
 0x208   : > { %2457 = vrot.lane.b32.xlu0 %v2451_v20, %s4459_s13  ;;  %2559 = vrot.lane.b32.xlu1 %v2553_v40, %s4462_s12  ;;  %s5685_s13 = smov 7   ;;  %v5279_v20 = vpop.permute.xlu0 %2359  ;;  %v5283_v53 = vpop.permute.xlu1 %2563  ;;  %v5691_v40 = vrot.slane %v4901_v58, 4 }
 0x20a   : > { %v3580_v25 = vsel %vm936_vm5, %v5691_v40, %v4901_v58  ;;  %v3688_v58 = vmul.bf16 %v4987_v16, %v3682_v51 }
 0x20b   : > { %v3586_v31 = vmul.bf16 %v4987_v16, %v3580_v25 }
 0x20c   : > { %2561 = vrot.lane.b32.xlu0 %v5683_v34, %s4462_s12  ;;  %2357 = vrot.lane.b32.xlu1 %v5684_v19, %s4460_s19  ;;  %s5686_s12 = smov 1   ;;  %v5305_v17 = vpop.permute.xlu1 %3800  ;;  %v5696_v34 = vrot.slane %v4915_v0, 4 }
 0x20e   : > { %v3478_v19 = vsel %vm1041_vm8, %v5696_v34, %v4915_v0 }
 0x20f   : > { %v3484_v24 = vmul.bf16 %v4987_v16, %v3478_v19 }
 0x210   : > { %2355 = vrot.lane.b32.xlu0 %v2349_v39, %s4460_s19  ;;  %2076 = vrot.lane.b32.xlu1 %v2070_v32, %s5685_s13  ;;  %s5687_s19 = smov 9   ;;  %v5311_v37 = vpop.permute.xlu1 %3698  ;;  %v3382_v32 = vmul.bf16 %v4987_v16, %v3376_v30 }
 0x214   : > { %2078 = vrot.lane.b32.xlu0 %v2071_v27, %s5685_s13  ;;  %2080 = vrot.lane.b32.xlu1 %v2072_v28, %s5685_s13  ;;  %v5333_v39 = vpop.permute.xlu1 %3494  ;;  %v3274_v28 = vsel %vm1018_vm10, %v5701_v12, %v5700_v23  ;;  %v5702_v27 = vmul.bf16 %v4989_v1, %v4954_v36 }
 0x215   : > { %v3280_v55 = vmul.bf16 %v4987_v16, %v3274_v28  ;;  %v614_v28 = vld [vmem:[%s5607_s6] sm:$0xf] }
 0x218   : > { %2180 = vrot.lane.b32.xlu0 %v2174_v42, %s5686_s12  ;;  %2182 = vrot.lane.b32.xlu1 %v2175_v14, %s5686_s12  ;;  %v5339_v46 = vpop.permute.xlu1 %3290  ;;  %v3068_v42 = vrot.slane %v5256_v50, 4 }
 0x21a   : > { %v3071_v48 = vsel %vm499_vm2, %v3068_v42, %v3069_v44 }
 0x21b   : > { %v3072_v30 = vsel %vm808_vm1, %v3071_v48, %v5261_v6 }
 0x21c   : > { %2184 = vrot.lane.b32.xlu0 %v2176_v45, %s5686_s12  ;;  %1868 = vrot.lane.b32.xlu1 %v1862_v8, %s5687_s19  ;;  %v2968_v8 = vsel %vm702_vm11, %v5706_v15, %v5705_v21 }
 0x21d   : > { %v2974_v40 = vmul.bf16 %v4987_v16, %v2968_v8 }
 0x220   : > { %1870 = vrot.lane.b32.xlu0 %v1863_v47, %s5687_s19  ;;  %1872 = vrot.lane.b32.xlu1 %v1864_v56, %s5687_s19  ;;  %v3070_v56 = vsel %vm808_vm1, %v3068_v42, %v5256_v50 }
 0x221   : > { %v3076_v25 = vmul.bf16 %v4987_v16, %v3070_v56 }
 0x224   : > { %1972 = vrot.lane.b32.xlu0 %v1966_v10, %s5689_s21  ;;  %1974 = vrot.lane.b32.xlu1 %v1967_v57, %s5689_s21  ;;  %v5293_v57 = vpop.permute.xlu0 %3596 }
 0x228   : > { %1976 = vrot.lane.b32.xlu0 %v1968_v22, %s5689_s21  ;;  %3796 = vrot.lane.b32.xlu1 %v3790_v49, %s4453_s25  ;;  %v5309_v63 = vpop.permute.xlu0 %3392  ;;  %v5709_v49 = vld [vmem:[#allocation13_spill] sm:$0xff]  ;;  %s296_s21 = sand.u32 1, %s4434_s28  }
 0x229   : > { %v5710_v7 = vmul.bf16 %v4989_v1, %v5709_v49 }
 0x22c   : > { %3798 = vrot.lane.b32.xlu0 %v5693_v18, %s4453_s25  ;;  %3594 = vrot.lane.b32.xlu1 %v5694_v26, %s4451_s22  ;;  %v5329_v5 = vpop.permute.xlu0 %3188  ;;  %v2999_v26 = vld [vmem:[#allocation2 + $0x14] sm:$0xf] }
 0x230   : > { %3592 = vrot.lane.b32.xlu0 %v3586_v31, %s4451_s22  ;;  %3694 = vrot.lane.b32.xlu1 %v3688_v58, %s5662_s23  ;;  %v5337_v0 = vpop.permute.xlu0 %2984 }
 0x234   : > { %3696 = vrot.lane.b32.xlu0 %v5697_v52, %s5662_s23  ;;  %3390 = vrot.lane.b32.xlu1 %v5698_v33, %s4449_s26  ;;  %s5703_s23 = smov 71   ;;  %v3078_v52 = vmul.bf16 %v3069_v44, %v2999_v26 }
 0x238   : > { %3388 = vrot.lane.b32.xlu0 %v3382_v32, %s4449_s26  ;;  %3490 = vrot.lane.b32.xlu1 %v3484_v24, %s4452_s24  ;;  %v3077_v24 = vmul.bf16 %v4989_v1, %v3072_v30  ;;  %s4314_s26 = sshll.u32 %s4531_s9, 8  ;;  %s4033_s9 = scalar_lea.sflag [#allocation5], %s296_s21 }
 0x239   : > { %s5558_s25 = scalar_lea.hbm %s5609_s8, %s4314_s26 }
 0x23c   : > { %3492 = vrot.lane.b32.xlu0 %v5702_v27, %s4452_s24  ;;  %3186 = vrot.lane.b32.xlu1 %v5704_v4, %s5703_s23 }
 0x23e   : > { %v1551_v59 = vpop.permute.xlu1 %1550  ;;  %v1549_v43 = vpop.permute.xlu0 %1548 }
 0x23f   : > { %v1555_v14 = vrot.slane %v1551_v59, 4  ;;  %v1554_v13 = vrot.slane %v1549_v43, 4 }
 0x240   : > { %3184 = vrot.lane.b32.xlu0 %v3178_v35, %s5703_s23  ;;  %3286 = vrot.lane.b32.xlu1 %v3280_v55, %s5664_s17  ;;  %s4110_s23 = sshll.u32 %s296_s21, 4 }
 0x241   : > { %v1557_v36 = vsel %vm499_vm2, %v1554_v13, %v1555_v14  ;;  %s298_s22 = scalar_lea.vmem [#allocation4], %s4110_s23 }
 0x242   : > { %v1558_v45 = vsel %vm702_vm11, %v1549_v43, %v1557_v36  ;;  %v1553_v60 = vpop.permute.xlu0 %1552  ;;  %v1343_v41 = vpop.permute.xlu1 %1342 }
 0x243   : > { %v4178_v47 = vcombine.low %v1558_v45, %v1558_v45  ;;  %v4179_v9 = vcombine.high %v1558_v45, %v1558_v45  ;;  %v1556_v10 = vrot.slane %v1553_v60, 4  ;;  %v1348_v34 = vrot.slane %v1343_v41, 4 }
 0x244   : > { %3288 = vrot.lane.b32.xlu0 %v5708_v61, %s5664_s17  ;;  %2982 = vrot.lane.b32.xlu1 %v5710_v7, %s5666_s18 }
 0x245   : > { %v1559_v22 = vsel %vm499_vm2, %v1555_v14, %v1556_v10  ;;  %4182 = vmatprep.subr.msk.bf16.mxu0 %vm499_vm2, %v4179_v9  ;;  %v1679_v50 = vsel %vm499_vm2, %v4178_v47, 0 }
 0x246   : > { %v1560_v62 = vsel %vm702_vm11, %v1551_v59, %v1559_v22  ;;  %1697 = vmatpush1.bf16.msra.mxu0 %v1679_v50  ;;  %v1345_v51 = vpop.permute.xlu0 %1344  ;;  %v1347_v18 = vpop.permute.xlu1 %1346 }
 0x247   : > { %v1349_v31 = vrot.slane %v1345_v51, 4  ;;  %v4181_v58 = vcombine.high %v1560_v62, %v1560_v62  ;;  %v4180_v2 = vcombine.low %v1560_v62, %v1560_v62  ;;  %v1350_v3 = vrot.slane %v1347_v18, 4 }
 0x248   : > { %2980 = vrot.lane.b32.xlu0 %v2974_v40, %s5666_s18  ;;  %3082 = vrot.lane.b32.xlu1 %v3076_v25, %s5677_s20  ;;  %s4464_s18 = smov [#allocation4]  }
 0x249   : > { %4184 = vmatprep.subr.msk.bf16.mxu1 %vm499_vm2, %v4181_v58  ;;  %v1685_v19 = vsel %vm499_vm2, %v4180_v2, 0  ;;  %v1351_v29 = vsel %vm499_vm2, %v1348_v34, %v1349_v31  ;;  %v1353_v59 = vsel %vm499_vm2, %v1349_v31, %v1350_v3  ;;  %s4386_s13 = sshll.u32 %s4464_s18, 4  ;;  %s4387_s13 = int_to_ptr.vmem [resolvable:$false] %s4386_s13 }
 0x24a   : > { %1738 = vmatpush1.bf16.msra.mxu1 %v1685_v19  ;;  %v1446_v33 = vpop.permute.xlu0 %1445  ;;  %v1448_v32 = vpop.permute.xlu1 %1447  ;;  %v1352_v35 = vsel %vm913_vm9, %v1343_v41, %v1351_v29  ;;  %v1354_v21 = vsel %vm913_vm9, %v1345_v51, %v1353_v59  ;;  %s4388_s12 = scalar_lea.vmem %s4387_s13, 512 }
 0x24b   : > { %v1451_v23 = vrot.slane %v1446_v33, 4  ;;  %v1452_v6 = vrot.slane %v1448_v32, 4 }
 0x24c   : > { %3084 = vrot.lane.b32.xlu0 %v3077_v24, %s5677_s20  ;;  %3086 = vrot.lane.b32.xlu1 %v3078_v52, %s5677_s20  ;;  %s4047_s20 = sshll.u32 %s298_s22, 4  ;;  %s5560_s20 = int_to_ptr.vmem [resolvable:$true] %s4047_s20 }
 0x24d   : > { %v1454_v12 = vsel %vm499_vm2, %v1451_v23, %v1452_v6  ;;  %s4382_s17 = scalar_lea.vmem %s5560_s20, 256  ;;  %p4389_p0 = scmp.lt.s32.totalorder %s5560_s20, %s4387_s13 }
 0x24e   : > { %v1450_v27 = vpop.permute.xlu0 %1449  ;;  %v1137_v4 = vpop.permute.xlu1 %1136  ;;  %v1455_v55 = vsel %vm808_vm1, %v1446_v33, %v1454_v12  ;;  %v4202_v12 = vld.sshfl [vmem:[%s5608_s7 + $0x10] sm:$0x33 pattern:$0x75316420]  ;;  %p4383_p11 = scmp.ne.s32.totalorder %s5560_s20, %s4382_s17  ;;  %p4390_p1 = scmp.lt.s32.totalorder %s4388_s12, %s4382_s17 }
 0x24f   : > { %v1453_v43 = vrot.slane %v1450_v27, 4  ;;  %v4174_v42 = vcombine.low %v1352_v35, %v1455_v55  ;;  %v4175_v14 = vcombine.high %v1352_v35, %v1455_v55  ;;  %v1142_v41 = vrot.slane %v1137_v4, 4 }
 0x250   : > { %617 = vperm.xlu0 %4374, %v614_v28   ;;  %p4384_p12 = pnand %p4383_p11, %p4548_p5  ;;  %p4391_p2 = por %p4390_p1, %p4389_p0 }
 0x251   : > { %v1456_v13 = vsel %vm499_vm2, %v1452_v6, %v1453_v43  ;;  %1698 = vmatprep.subr.bf16.mxu0 %v4175_v14  ;;  %v2209_v14 = vcombine.high %v4202_v12, %v4202_v12 }
 0x252   : > { %1699 = vmatpush1.bf16.msra.mxu0 %v4174_v42  ;;  %v1139_v44 = vpop.permute.xlu0 %1138  ;;  %v1141_v36 = vpop.permute.xlu1 %1140  ;;  %v1457_v15 = vsel %vm808_vm1, %v1448_v32, %v1456_v13  ;;  %p4385_p13 = pneg %p4384_p12 }
 0x253   : > { %v1143_v8 = vrot.slane %v1139_v44, 4  ;;  %v4176_v45 = vcombine.low %v1354_v21, %v1457_v15  ;;  %v4177_v60 = vcombine.high %v1354_v21, %v1457_v15  ;;  %v1144_v10 = vrot.slane %v1141_v36, 4 }
 0x254   : > { %p4392_p3 = pnand %p4391_p2, %p4385_p13 }
 0x255   : > { %1739 = vmatprep.subr.bf16.mxu1 %v4177_v60  ;;  %v1145_v9 = vsel %vm499_vm2, %v1142_v41, %v1143_v8  ;;  %v1147_v40 = vsel %vm499_vm2, %v1143_v8, %v1144_v10  ;;  %v5711_v41 = vld [vmem:[#allocation8_spill] sm:$0xff] }
 0x256   : > { %1740 = vmatpush1.bf16.msra.mxu1 %v4176_v45  ;;  %v1240_v56 = vpop.permute.xlu0 %1239  ;;  %v1242_v47 = vpop.permute.xlu1 %1241  ;;  %v1146_v22 = vsel %vm1123_vm7, %v1137_v4, %v1145_v9  ;;  %v1148_v58 = vsel %vm1123_vm7, %v1139_v44, %v1147_v40 }
 0x257   : > { %v1245_v48 = vrot.slane %v1240_v56, 4  ;;  %v1246_v11 = vrot.slane %v1242_v47, 4 }
 0x259   : > { %v1248_v61 = vsel %vm499_vm2, %v1245_v48, %v1246_v11 }
 0x25a   : > { %v1244_v49 = vpop.permute.xlu0 %1243  ;;  %v927_v7 = vpop.permute.xlu1 %926  ;;  %v1249_v50 = vsel %vm1018_vm10, %v1240_v56, %v1248_v61  ;;  %v2216_v56 = vrot.slane %v4202_v12, %v5711_v41 }
 0x25b   : > { %v1247_v25 = vrot.slane %v1244_v49, 4  ;;  %v4170_v62 = vcombine.low %v1146_v22, %v1249_v50  ;;  %v4171_v51 = vcombine.high %v1146_v22, %v1249_v50  ;;  %v932_v52 = vrot.slane %v927_v7, 4 }
 0x25c   : > { %v2224_v22 = vcombine.high %v2216_v56, %v2216_v56 }
 0x25d   : > { %v1250_v18 = vsel %vm499_vm2, %v1246_v11, %v1247_v25  ;;  %1700 = vmatprep.subr.bf16.mxu0 %v4171_v51 }
 0x25e   : > { %1701 = vmatpush1.bf16.msra.mxu0 %v4170_v62  ;;  %v929_v26 = vpop.permute.xlu0 %928  ;;  %v931_v31 = vpop.permute.xlu1 %930  ;;  %v1251_v2 = vsel %vm1018_vm10, %v1242_v47, %v1250_v18  ;;  %v2223_v47 = vrot.slane %v2209_v14, %v5711_v41 }
 0x25f   : > { %v933_v30 = vrot.slane %v929_v26, 4  ;;  %v4172_v34 = vcombine.low %v1148_v58, %v1251_v2  ;;  %v4173_v19 = vcombine.high %v1148_v58, %v1251_v2  ;;  %v934_v29 = vrot.slane %v931_v31, 4 }
 0x260   : > { %v2225_v50 = vcombine.high %v2223_v47, %v2223_v47 }
 0x261   : > { %1741 = vmatprep.subr.bf16.mxu1 %v4173_v19  ;;  %v935_v24 = vsel %vm499_vm2, %v932_v52, %v933_v30  ;;  %v938_v55 = vsel %vm499_vm2, %v933_v30, %v934_v29  ;;  %v2241_v30 = vpack.i.b16 %v2224_v22, %v2224_v22  ;;  %v2227_v52 = vpack.i.b16 %v2216_v56, %v2216_v56  ;;  %v1565_v29 = vld [vmem:[%s5606_s5] sm:$0x3] }
 0x262   : > { %1742 = vmatpush1.bf16.msra.mxu1 %v4172_v34  ;;  %v1032_v33 = vpop.permute.xlu0 %1031  ;;  %v1034_v32 = vpop.permute.xlu1 %1033  ;;  %v937_v4 = vsel %vm936_vm5, %v927_v7, %v935_v24  ;;  %v939_v21 = vsel %vm936_vm5, %v929_v26, %v938_v55  ;;  %v2248_v34 = vpack.i.b16 %v2225_v50, %v2225_v50  ;;  %v2465_v56 = vrot.slane %v5267_v38, 4 }
 0x263   : > { %v1037_v3 = vrot.slane %v1032_v33, 4  ;;  %v1038_v23 = vrot.slane %v1034_v32, 4 }
 0x265   : > { %v1040_v6 = vsel %vm499_vm2, %v1037_v3, %v1038_v23 }
 0x266   : > { %v1036_v28 = vpop.permute.xlu0 %1035  ;;  %v717_v27 = vpop.permute.xlu1 %716  ;;  %v1042_v35 = vsel %vm1041_vm8, %v1032_v33, %v1040_v6  ;;  %v2669_v33 = vrot.slane %v5277_v54, 4  ;;  %v2234_v6 = vpack.i.b16 %v2223_v47, %v2223_v47 }
 0x267   : > { %v1039_v59 = vrot.slane %v1036_v28, 4  ;;  %v4166_v43 = vcombine.low %v937_v4, %v1042_v35  ;;  %v4167_v42 = vcombine.high %v937_v4, %v1042_v35  ;;  %v722_v9 = vrot.slane %v717_v27, 4  ;;  %v5712_v35 = vld [vmem:[#allocation9_spill] sm:$0xff] }
 0x268   : > { %v2246_v55 = vrot.slane %v2241_v30, %v5712_v35  ;;  %v2253_v54 = vrot.slane %v2248_v34, %v5712_v35  ;;  %v2239_v41 = vrot.slane %v2234_v6, %v5712_v35 }
 0x269   : > { %v1043_v13 = vsel %vm499_vm2, %v1038_v23, %v1039_v59  ;;  %1702 = vmatprep.subr.bf16.mxu0 %v4167_v42 }
 0x26a   : > { %1703 = vmatpush1.bf16.msra.mxu0 %v4166_v43  ;;  %v719_v44 = vpop.permute.xlu0 %718  ;;  %v721_v36 = vpop.permute.xlu1 %720  ;;  %v1044_v15 = vsel %vm1041_vm8, %v1034_v32, %v1043_v13 }
 0x26b   : > { %v723_v8 = vrot.slane %v719_v44, 4  ;;  %v4168_v45 = vcombine.low %v939_v21, %v1044_v15  ;;  %v4169_v60 = vcombine.high %v939_v21, %v1044_v15  ;;  %v724_v61 = vrot.slane %v721_v36, 4 }
 0x26c   : > { %v2232_v21 = vrot.slane %v2227_v52, %v5712_v35  ;;  %v5713_v15 = vmov 0  }
 0x26d   : > { %1743 = vmatprep.subr.bf16.mxu1 %v4169_v60  ;;  %v725_v11 = vsel %vm499_vm2, %v722_v9, %v723_v8  ;;  %v728_v26 = vsel %vm499_vm2, %v723_v8, %v724_v61  ;;  %v2363_v61 = vrot.slane %v5279_v20, 4 }
 0x26e   : > { %1744 = vmatpush1.bf16.msra.mxu1 %v4168_v45  ;;  %v822_v10 = vpop.permute.xlu0 %821  ;;  %v824_v48 = vpop.permute.xlu1 %823  ;;  %v727_v51 = vsel %vm726_vm4, %v717_v27, %v725_v11  ;;  %v729_v3 = vsel %vm726_vm4, %v719_v44, %v728_v26  ;;  %v2567_v11 = vrot.slane %v5283_v53, 4  ;;  %v4203_v20 = vcombine.low %v2232_v21, %v2239_v41 }
 0x26f   : > { %v827_v49 = vrot.slane %v822_v10, 4  ;;  %v828_v7 = vrot.slane %v824_v48, 4 }
 0x270   : > { %v2266_v6 = vmul.bf16 %v4987_v16, %v4203_v20 }
 0x271   : > { %v830_v40 = vsel %vm499_vm2, %v827_v49, %v828_v7 }
 0x272   : > { %v826_v25 = vpop.permute.xlu0 %825  ;;  %v2662_v62 = vpop.permute.xlu1 %2661  ;;  %v832_v18 = vsel %vm831_vm6, %v822_v10, %v830_v40  ;;  %v4204_v10 = vcombine.low %v2246_v55, %v2253_v54 }
 0x273   : > { %v829_v31 = vrot.slane %v826_v25, 4  ;;  %v4162_v58 = vcombine.low %v727_v51, %v832_v18  ;;  %v4163_v2 = vcombine.high %v727_v51, %v832_v18  ;;  %v2667_v12 = vrot.slane %v2662_v62, 4 }
 0x274   : > { %v2267_v53 = vmul.bf16 %v4989_v1, %v4204_v10 }
 0x275   : > { %v833_v19 = vsel %vm499_vm2, %v828_v7, %v829_v31  ;;  %1704 = vmatprep.subr.bf16.mxu0 %v4163_v2 }
 0x276   : > { %v2664_v32 = vpop.permute.xlu0 %2663  ;;  %1705 = vmatpush1.bf16.msra.mxu0 %v4162_v58  ;;  %v2460_v24 = vpop.permute.xlu1 %2459  ;;  %v834_v23 = vsel %vm831_vm6, %v824_v48, %v833_v19 }
 0x277   : > { %v2668_v28 = vrot.slane %v2664_v32, 4  ;;  %v4164_v27 = vcombine.low %v729_v3, %v834_v23  ;;  %v4165_v4 = vcombine.high %v729_v3, %v834_v23  ;;  %v2464_v14 = vrot.slane %v2460_v24, 4 }
 0x279   : > { %v2670_v59 = vsel %vm499_vm2, %v2667_v12, %v2668_v28  ;;  %v2672_v43 = vsel %vm499_vm2, %v2668_v28, %v2669_v33  ;;  %4183 = vmatmul.mubr.msk.bf16.vlgmr.msra.gmra.mxu0 %vm831_vm6, %v1565_v29  ;;  %1745 = vmatprep.subr.bf16.mxu1 %v4165_v4  ;;  %v2468_v49 = vsel %vm499_vm2, %v2464_v14, %v2465_v56 }
 0x27a   : > { %v2673_v42 = vsel %vm1855_vm12, %v2664_v32, %v2672_v43  ;;  %v2458_v13 = vpop.permute.xlu0 %2457  ;;  %1746 = vmatpush1.bf16.msra.mxu1 %v4164_v27  ;;  %v2560_v44 = vpop.permute.xlu1 %2559  ;;  %v2671_v36 = vsel %vm1855_vm12, %v2662_v62, %v2670_v59  ;;  %2835 = vmatprep.mubr.bf16.mxu0 %v5713_v15  ;;  %v2469_v51 = vsel %vm2063_vm3, %v2460_v24, %v2468_v49  ;;  %vm5714_vm12 = vcmask 72704  }
 0x27b   : > { %v4240_v8 = vcombine.low %v2673_v42, %v2673_v42  ;;  %v4241_v45 = vcombine.high %v2673_v42, %v2673_v42  ;;  %v2463_v60 = vrot.slane %v2458_v13, 4  ;;  %v4239_v47 = vcombine.high %v2671_v36, %v2671_v36 }
 0x27c   : > { %v4238_v9 = vcombine.low %v2671_v36, %v2671_v36  ;;  %v2565_v40 = vrot.slane %v2560_v44, 4 }
 0x27d   : > { %4185 = vmatmul.mubr.msk.bf16.vlgmr.msra.gmra.mxu1 %vm831_vm6, %v1565_v29  ;;  %4244 = vmatprep.subr.msk.bf16.mxu1 %vm499_vm2, %v4241_v45  ;;  %v2798_v48 = vsel %vm499_vm2, %v4240_v8, 0  ;;  %v2466_v50 = vsel %vm499_vm2, %v2463_v60, %v2464_v14 }
 0x27e   : > { %4242 = vmatprep.subr.msk.bf16.mxu0 %vm499_vm2, %v4239_v47  ;;  %v2562_v7 = vpop.permute.xlu0 %2561  ;;  %v2792_v38 = vsel %vm499_vm2, %v4238_v9, 0  ;;  %2851 = vmatpush1.bf16.msra.mxu1 %v2798_v48  ;;  %v2358_v22 = vpop.permute.xlu1 %2357  ;;  %v2467_v58 = vsel %vm2063_vm3, %v2458_v13, %v2466_v50 }
 0x27f   : > { %v2566_v25 = vrot.slane %v2562_v7, 4  ;;  %2810 = vmatpush1.bf16.msra.mxu0 %v2792_v38  ;;  %v2362_v62 = vrot.slane %v2358_v22, 4  ;;  %2876 = vmatprep.mubr.bf16.mxu1 %v5713_v15 }
 0x281   : > { %v2568_v18 = vsel %vm499_vm2, %v2565_v40, %v2566_v25  ;;  %v2570_v26 = vsel %vm499_vm2, %v2566_v25, %v2567_v11  ;;  %v2366_v31 = vsel %vm499_vm2, %v2362_v62, %v2363_v61 }
 0x282   : > { %v2571_v2 = vsel %vm1959_vm0, %v2562_v7, %v2570_v26  ;;  %v2367_v30 = vsel %vm2167_vm14, %v2358_v22, %v2366_v31  ;;  %v2356_v34 = vpop.permute.xlu0 %2355  ;;  %v2077_v19 = vpop.permute.xlu1 %2076  ;;  %v2569_v52 = vsel %vm1959_vm0, %v2560_v44, %v2568_v18 }
 0x283   : > { %v4236_v1 = vcombine.low %v2469_v51, %v2571_v2  ;;  %v4237_v33 = vcombine.high %v2469_v51, %v2571_v2  ;;  %v4232_v32 = vcombine.low %v2267_v53, %v2367_v30  ;;  %v4233_v24 = vcombine.high %v2267_v53, %v2367_v30 }
 0x284   : > { %v2361_v29 = vrot.slane %v2356_v34, 4  ;;  %v4234_v3 = vcombine.low %v2467_v58, %v2569_v52  ;;  %v4235_v23 = vcombine.high %v2467_v58, %v2569_v52  ;;  %v2082_v59 = vrot.slane %v2077_v19, 4 }
 0x285   : > { %2852 = vmatprep.subr.bf16.mxu1 %v4237_v33  ;;  %v3804_v33 = vrot.slane %v5305_v17, 4 }
 0x286   : > { %v2364_v12 = vsel %vm499_vm2, %v2361_v29, %v2362_v62  ;;  %2811 = vmatprep.subr.bf16.mxu0 %v4235_v23  ;;  %v2079_v28 = vpop.permute.xlu0 %2078  ;;  %2853 = vmatpush1.bf16.msra.mxu1 %v4236_v1  ;;  %v2081_v27 = vpop.permute.xlu1 %2080  ;;  %v4221_v29 = vld [vmem:[%s5606_s5 + $0x2] sm:$0x3] }
 0x287   : > { %v2365_v4 = vsel %vm2167_vm14, %v2356_v34, %v2364_v12  ;;  %v2083_v35 = vrot.slane %v2079_v28, 4  ;;  %2812 = vmatpush1.bf16.msra.mxu0 %v4234_v3  ;;  %2854 = vmatprep.subr.bf16.mxu1 %v4233_v24  ;;  %v2084_v14 = vrot.slane %v2081_v27, 4  ;;  %vm5716_vm14 = vmmov %vm5714_vm12 }
 0x288   : > { %v4230_v55 = vcombine.low %v2266_v6, %v2365_v4  ;;  %v4231_v54 = vcombine.high %v2266_v6, %v2365_v4 }
 0x289   : > { %v2085_v16 = vsel %vm499_vm2, %v2082_v59, %v2083_v35  ;;  %v2088_v41 = vsel %vm499_vm2, %v2083_v35, %v2084_v14 }
 0x28a   : > { %2813 = vmatprep.subr.bf16.mxu0 %v4231_v54  ;;  %v2181_v43 = vpop.permute.xlu0 %2180  ;;  %2855 = vmatpush1.bf16.msra.mxu1 %v4232_v32  ;;  %v2183_v42 = vpop.permute.xlu1 %2182  ;;  %v2087_v45 = vsel %vm2086_vm13, %v2077_v19, %v2085_v16  ;;  %v2089_v61 = vsel %vm2086_vm13, %v2079_v28, %v2088_v41  ;;  %vm5715_vm13 = vcmask 64512   ;;  %v3702_v41 = vrot.slane %v5311_v37, 4 }
 0x28b   : > { %v2186_v13 = vrot.slane %v2181_v43, 4  ;;  %2814 = vmatpush1.bf16.msra.mxu0 %v4230_v55  ;;  %v2187_v44 = vrot.slane %v2183_v42, 4 }
 0x28d   : > { %v2189_v36 = vsel %vm499_vm2, %v2186_v13, %v2187_v44 }
 0x28e   : > { %v2185_v21 = vpop.permute.xlu0 %2184  ;;  %v1869_v8 = vpop.permute.xlu1 %1868  ;;  %v2191_v60 = vsel %vm2190_vm15, %v2181_v43, %v2189_v36  ;;  %v3600_v36 = vrot.slane %v5293_v57, 4 }
 0x28f   : > { %v2188_v56 = vrot.slane %v2185_v21, 4  ;;  %v4226_v47 = vcombine.low %v2087_v45, %v2191_v60  ;;  %v4227_v9 = vcombine.high %v2087_v45, %v2191_v60  ;;  %v1874_v50 = vrot.slane %v1869_v8, 4 }
 0x291   : > { %v2192_v10 = vsel %vm499_vm2, %v2187_v44, %v2188_v56  ;;  %2815 = vmatprep.subr.bf16.mxu0 %v4227_v9 }
 0x292   : > { %v1871_v48 = vpop.permute.xlu0 %1870  ;;  %2816 = vmatpush1.bf16.msra.mxu0 %v4226_v47  ;;  %v1873_v11 = vpop.permute.xlu1 %1872  ;;  %v2193_v49 = vsel %vm2190_vm15, %v2183_v42, %v2192_v10  ;;  %vm5717_vm15 = vmmov %vm5715_vm13 }
 0x293   : > { %v1875_v7 = vrot.slane %v1871_v48, 4  ;;  %v4228_v38 = vcombine.low %v2089_v61, %v2193_v49  ;;  %v4229_v22 = vcombine.high %v2089_v61, %v2193_v49  ;;  %v1876_v53 = vrot.slane %v1873_v11, 4 }
 0x295   : > { %2856 = vmatprep.subr.bf16.mxu1 %v4229_v22  ;;  %v1877_v62 = vsel %vm499_vm2, %v1874_v50, %v1875_v7  ;;  %v1880_v30 = vsel %vm499_vm2, %v1875_v7, %v1876_v53  ;;  %v3396_v53 = vrot.slane %v5309_v63, 4 }
 0x296   : > { %v1973_v40 = vpop.permute.xlu0 %1972  ;;  %2857 = vmatpush1.bf16.msra.mxu1 %v4228_v38  ;;  %v1975_v25 = vpop.permute.xlu1 %1974  ;;  %v1879_v58 = vsel %vm5714_vm12, %v1869_v8, %v1877_v62  ;;  %v1881_v3 = vsel %vm5716_vm14, %v1871_v48, %v1880_v30 }
 0x297   : > { %v1978_v20 = vrot.slane %v1973_v40, 4  ;;  %v1979_v51 = vrot.slane %v1975_v25, 4 }
 0x299   : > { %v1981_v18 = vsel %vm499_vm2, %v1978_v20, %v1979_v51 }
 0x29a   : > { %v1977_v26 = vpop.permute.xlu0 %1976  ;;  %v3797_v31 = vpop.permute.xlu1 %3796  ;;  %v1983_v2 = vsel %vm5715_vm13, %v1973_v40, %v1981_v18  ;;  %v3498_v18 = vrot.slane %v5333_v39, 4 }
 0x29b   : > { %v1980_v34 = vrot.slane %v1977_v26, 4  ;;  %v4222_v19 = vcombine.low %v1879_v58, %v1983_v2  ;;  %v4223_v52 = vcombine.high %v1879_v58, %v1983_v2  ;;  %v3802_v6 = vrot.slane %v3797_v31, 4 }
 0x29d   : > { %v1984_v1 = vsel %vm499_vm2, %v1979_v51, %v1980_v34  ;;  %2817 = vmatprep.subr.bf16.mxu0 %v4223_v52 }
 0x29e   : > { %v3799_v32 = vpop.permute.xlu0 %3798  ;;  %2818 = vmatpush1.bf16.msra.mxu0 %v4222_v19  ;;  %v3595_v24 = vpop.permute.xlu1 %3594  ;;  %v1985_v23 = vsel %vm5717_vm15, %v1975_v25, %v1984_v1 }
 0x29f   : > { %v3803_v12 = vrot.slane %v3799_v32, 4  ;;  %v4224_v28 = vcombine.low %v1881_v3, %v1985_v23  ;;  %v4225_v27 = vcombine.high %v1881_v3, %v1985_v23  ;;  %v3599_v16 = vrot.slane %v3595_v24, 4 }
 0x2a1   : > { %v3805_v4 = vsel %vm499_vm2, %v3802_v6, %v3803_v12  ;;  %v3807_v35 = vsel %vm499_vm2, %v3803_v12, %v3804_v33  ;;  %4243 = vmatmul.mubr.msk.bf16.vlgmr.msra.gmra.mxu0 %vm831_vm6, %v4221_v29  ;;  %2858 = vmatprep.subr.bf16.mxu1 %v4225_v27  ;;  %v3603_v56 = vsel %vm499_vm2, %v3599_v16, %v3600_v36  ;;  %v3192_v12 = vrot.slane %v5329_v5, 4 }
 0x2a2   : > { %v3808_v17 = vsel %vm702_vm11, %v3799_v32, %v3807_v35  ;;  %v3593_v55 = vpop.permute.xlu0 %3592  ;;  %2859 = vmatpush1.bf16.msra.mxu1 %v4224_v28  ;;  %v3695_v54 = vpop.permute.xlu1 %3694  ;;  %v3806_v59 = vsel %vm702_vm11, %v3797_v31, %v3805_v4  ;;  %3970 = vmatprep.mubr.bf16.mxu0 %v5713_v15  ;;  %v3604_v11 = vsel %vm913_vm9, %v3595_v24, %v3603_v56  ;;  %v3294_v4 = vrot.slane %v5339_v46, 4 }
 0x2a3   : > { %v4300_v43 = vcombine.low %v3808_v17, %v3808_v17  ;;  %v4301_v42 = vcombine.high %v3808_v17, %v3808_v17  ;;  %v3598_v14 = vrot.slane %v3593_v55, 4  ;;  %v4299_v13 = vcombine.high %v3806_v59, %v3806_v59 }
 0x2a4   : > { %v4298_v44 = vcombine.low %v3806_v59, %v3806_v59  ;;  %v3700_v47 = vrot.slane %v3695_v54, 4 }
 0x2a5   : > { %4245 = vmatmul.mubr.msk.bf16.vlgmr.msra.gmra.mxu1 %vm831_vm6, %v4221_v29  ;;  %4304 = vmatprep.subr.msk.bf16.mxu1 %vm499_vm2, %v4301_v42  ;;  %v3933_v21 = vsel %vm499_vm2, %v4300_v43, 0  ;;  %v3601_v57 = vsel %vm499_vm2, %v3598_v14, %v3599_v16 }
 0x2a6   : > { %4302 = vmatprep.subr.msk.bf16.mxu0 %vm499_vm2, %v4299_v13  ;;  %v3697_v8 = vpop.permute.xlu0 %3696  ;;  %v3927_v45 = vsel %vm499_vm2, %v4298_v44, 0  ;;  %3986 = vmatpush1.bf16.msra.mxu1 %v3933_v21  ;;  %v3391_v60 = vpop.permute.xlu1 %3390  ;;  %v3602_v38 = vsel %vm913_vm9, %v3593_v55, %v3601_v57 }
 0x2a7   : > { %v3701_v9 = vrot.slane %v3697_v8, 4  ;;  %3945 = vmatpush1.bf16.msra.mxu0 %v3927_v45  ;;  %4011 = vmatprep.mubr.bf16.mxu1 %v5713_v15  ;;  %v3395_v40 = vrot.slane %v3391_v60, 4  ;;  %v2988_v45 = vrot.slane %v5337_v0, 4 }
 0x2a9   : > { %v3703_v10 = vsel %vm499_vm2, %v3700_v47, %v3701_v9  ;;  %v3705_v48 = vsel %vm499_vm2, %v3701_v9, %v3702_v41  ;;  %v3399_v26 = vsel %vm499_vm2, %v3395_v40, %v3396_v53 }
 0x2aa   : > { %v3706_v61 = vsel %vm808_vm1, %v3697_v8, %v3705_v48  ;;  %v3389_v49 = vpop.permute.xlu0 %3388  ;;  %v3491_v7 = vpop.permute.xlu1 %3490  ;;  %v3704_v37 = vsel %vm808_vm1, %v3695_v54, %v3703_v10  ;;  %v3400_v63 = vsel %vm1123_vm7, %v3391_v60, %v3399_v26 }
 0x2ab   : > { %v4296_v22 = vcombine.low %v3604_v11, %v3706_v61  ;;  %v4297_v50 = vcombine.high %v3604_v11, %v3706_v61  ;;  %v3394_v15 = vrot.slane %v3389_v49, 4  ;;  %v4294_v25 = vcombine.low %v3602_v38, %v3704_v37 }
 0x2ac   : > { %v4295_v62 = vcombine.high %v3602_v38, %v3704_v37  ;;  %v3496_v31 = vrot.slane %v3491_v7, 4 }
 0x2ad   : > { %3987 = vmatprep.subr.bf16.mxu1 %v4297_v50  ;;  %v3397_v2 = vsel %vm499_vm2, %v3394_v15, %v3395_v40 }
 0x2ae   : > { %3946 = vmatprep.subr.bf16.mxu0 %v4295_v62  ;;  %v3493_v20 = vpop.permute.xlu0 %3492  ;;  %3988 = vmatpush1.bf16.msra.mxu1 %v4296_v22  ;;  %v3187_v51 = vpop.permute.xlu1 %3186  ;;  %v3398_v39 = vsel %vm1123_vm7, %v3389_v49, %v3397_v2 }
 0x2af   : > { %v3497_v58 = vrot.slane %v3493_v20, 4  ;;  %3947 = vmatpush1.bf16.msra.mxu0 %v4294_v25  ;;  %v3191_v29 = vrot.slane %v3187_v51, 4  ;;  %v4281_v25 = vld [vmem:[%s5606_s5 + $0x4] sm:$0x3] }
 0x2b1   : > { %v3499_v30 = vsel %vm499_vm2, %v3496_v31, %v3497_v58  ;;  %v3501_v34 = vsel %vm499_vm2, %v3497_v58, %v3498_v18  ;;  %v3195_v35 = vsel %vm499_vm2, %v3191_v29, %v3192_v12 }
 0x2b2   : > { %v3502_v19 = vsel %vm1018_vm10, %v3493_v20, %v3501_v34  ;;  %v3185_v52 = vpop.permute.xlu0 %3184  ;;  %v3287_v1 = vpop.permute.xlu1 %3286  ;;  %v3500_v33 = vsel %vm1018_vm10, %v3491_v7, %v3499_v30  ;;  %v3196_v5 = vsel %vm936_vm5, %v3187_v51, %v3195_v35  ;;  %v4381_v35 = vld [vmem:[%s4578_s10 + $0x8] sm:$0xff] }
 0x2b3   : > { %v4292_v32 = vcombine.low %v3400_v63, %v3502_v19  ;;  %v4293_v24 = vcombine.high %v3400_v63, %v3502_v19  ;;  %v3190_v3 = vrot.slane %v3185_v52, 4  ;;  %v4290_v23 = vcombine.low %v3398_v39, %v3500_v33 }
 0x2b4   : > { %v4291_v6 = vcombine.high %v3398_v39, %v3500_v33  ;;  %v3292_v17 = vrot.slane %v3287_v1, 4 }
 0x2b5   : > { %3989 = vmatprep.subr.bf16.mxu1 %v4293_v24  ;;  %v3193_v54 = vsel %vm499_vm2, %v3190_v3, %v3191_v29  ;;  %v4463_v24 = vmov 839922192  }
 0x2b6   : > { %3948 = vmatprep.subr.bf16.mxu0 %v4291_v6  ;;  %v3289_v28 = vpop.permute.xlu0 %3288  ;;  %3990 = vmatpush1.bf16.msra.mxu1 %v4292_v32  ;;  %v2983_v27 = vpop.permute.xlu1 %2982  ;;  %v3194_v44 = vsel %vm936_vm5, %v3185_v52, %v3193_v54  ;;  %v620_v29 = vunpack.c.l.s4 %v4463_v24 }
 0x2b7   : > { %v3293_v55 = vrot.slane %v3289_v28, 4  ;;  %3949 = vmatpush1.bf16.msra.mxu0 %v4290_v23  ;;  %v2987_v16 = vrot.slane %v2983_v27, 4  ;;  %v5718_v23 = vld [vmem:[#allocation7_spill] sm:$0xff] }
 0x2b8   : > { %v621_v3 = vunpack.c.0.s8 %v620_v29 }
 0x2b9   : > { %v3295_v59 = vsel %vm499_vm2, %v3292_v17, %v3293_v55  ;;  %v3297_v43 = vsel %vm499_vm2, %v3293_v55, %v3294_v4  ;;  %v2991_v56 = vsel %vm499_vm2, %v2987_v16, %v2988_v45 }
 0x2ba   : > { %v3298_v42 = vsel %vm1041_vm8, %v3289_v28, %v3297_v43  ;;  %v2981_v14 = vpop.permute.xlu0 %2980  ;;  %v3083_v13 = vpop.permute.xlu1 %3082  ;;  %v3296_v46 = vsel %vm1041_vm8, %v3287_v1, %v3295_v59  ;;  %v2992_v0 = vsel %vm726_vm4, %v2983_v27, %v2991_v56  ;;  %v624_v6 = vsub.s32 %v621_v3, %v5718_v23  ;;  %v4380_v27 = vld [vmem:[%s4578_s10] sm:$0xff] }
 0x2bb   : > { %v4288_v36 = vcombine.low %v3196_v5, %v3298_v42  ;;  %v4289_v21 = vcombine.high %v3196_v5, %v3298_v42  ;;  %v2986_v8 = vrot.slane %v2981_v14, 4  ;;  %v4286_v60 = vcombine.low %v3194_v44, %v3296_v46 }
 0x2bc   : > { %v4287_v41 = vcombine.high %v3194_v44, %v3296_v46  ;;  %v3088_v10 = vrot.slane %v3083_v13, 4 }
 0x2bd   : > { %3991 = vmatprep.subr.bf16.mxu1 %v4289_v21  ;;  %v2989_v57 = vsel %vm499_vm2, %v2986_v8, %v2987_v16 }
 0x2be   : > { %3950 = vmatprep.subr.bf16.mxu0 %v4287_v41  ;;  %v3085_v47 = vpop.permute.xlu0 %3084  ;;  %3992 = vmatpush1.bf16.msra.mxu1 %v4288_v36  ;;  %v3087_v9 = vpop.permute.xlu1 %3086  ;;  %v2990_v7 = vsel %vm726_vm4, %v2981_v14, %v2989_v57 }
 0x2bf   : > { %v3089_v48 = vrot.slane %v3085_v47, 4  ;;  %3951 = vmatpush1.bf16.msra.mxu0 %v4286_v60  ;;  %v3090_v11 = vrot.slane %v3087_v9, 4 }
 0x2c1   : > { %v3091_v61 = vsel %vm499_vm2, %v3088_v10, %v3089_v48  ;;  %v3093_v49 = vsel %vm499_vm2, %v3089_v48, %v3090_v11 }
 0x2c2   : > { %v3092_v37 = vsel %vm831_vm6, %v3083_v13, %v3091_v61  ;;  %v3094_v38 = vsel %vm831_vm6, %v3085_v47, %v3093_v49 }
 0x2c3   : > { %v4282_v22 = vcombine.low %v2990_v7, %v3092_v37  ;;  %v4283_v50 = vcombine.high %v2990_v7, %v3092_v37  ;;  %v4284_v40 = vcombine.low %v2992_v0, %v3094_v38  ;;  %v4285_v15 = vcombine.high %v2992_v0, %v3094_v38 }
 0x2c5   : > { %3952 = vmatprep.subr.bf16.mxu0 %v4283_v50  ;;  %3993 = vmatprep.subr.bf16.mxu1 %v4285_v15 }
 0x2c6   : > { %3953 = vmatpush1.bf16.msra.mxu0 %v4282_v22  ;;  %3994 = vmatpush1.bf16.msra.mxu1 %v4284_v40 }
 0x2c9   : > { %4303 = vmatmul.mubr.msk.bf16.vlgmr.msra.gmra.mxu0 %vm831_vm6, %v4281_v25  ;;  %4305 = vmatmul.mubr.msk.bf16.vlgmr.msra.gmra.mxu1 %vm831_vm6, %v4281_v25 }
 0x2cb   : > { %v618_v12 = vpop.permute.xlu0 %617 }
 0x2cc   : > { %v625_v28 = vrot.slane %v618_v12, %v624_v6 }
 0x2ce   : > { %v627_v4 = vadd.f32 %v4380_v27, %v625_v28  ;;  %v628_v17 = vadd.f32 %v4381_v35, %v625_v28 }
 0x339   : > { %v1724_v62 = vpop.f32.mrf.mxu0 }
 0x33b   : > { %v1726_v53 = vpop.f32.mrf.mxu0 }
 0x33c   : > { %v1776_v20 = vcombine.low %v1724_v62, %v1726_v53 }
 0x33d   : > { %v1765_v51 = vpop.f32.mrf.mxu1  ;;  %v1728_v18 = vpop.f32.mrf.mxu0 }
 0x33e   : > { %v1780_v5 = vadd.f32 %v1776_v20, %v627_v4 }
 0x33f   : > { %v1767_v26 = vpop.f32.mrf.mxu1  ;;  %v1729_v31 = vpop.f32.mrf.mxu0 }
 0x340   : > { %v1777_v58 = vcombine.low %v1765_v51, %v1767_v26 }
 0x341   : > { %v1769_v2 = vpop.f32.mrf.mxu1 }
 0x342   : > { %v1781_v42 = vadd.f32 %v1777_v58, %v628_v17 }
 0x343   : > { %v1770_v30 = vpop.f32.mrf.mxu1 }
 0x361   : > { %v2837_v34 = vpop.f32.mrf.mxu0 }
 0x363   : > { %v2839_v63 = vpop.f32.mrf.mxu0 }
 0x364   : > { %v2889_v55 = vcombine.low %v2837_v34, %v2839_v63 }
 0x365   : > { %v2878_v19 = vpop.f32.mrf.mxu1  ;;  %v2841_v52 = vpop.f32.mrf.mxu0 }
 0x366   : > { %v2893_v13 = vadd.f32 %v2889_v55, %v1780_v5 }
 0x367   : > { %v2880_v1 = vpop.f32.mrf.mxu1  ;;  %v2842_v33 = vpop.f32.mrf.mxu0 }
 0x368   : > { %v2890_v54 = vcombine.low %v2878_v19, %v2880_v1 }
 0x369   : > { %v2882_v39 = vpop.f32.mrf.mxu1 }
 0x36a   : > { %v2894_v46 = vadd.f32 %v2890_v54, %v1781_v42 }
 0x36b   : > { %v2883_v32 = vpop.f32.mrf.mxu1 }
 0x389   : > { %v3972_v59 = vpop.f32.mrf.mxu0  ;;  %v4013_v43 = vpop.f32.mrf.mxu1 }
 0x38b   : > { %v3974_v16 = vpop.f32.mrf.mxu0  ;;  %v4015_v14 = vpop.f32.mrf.mxu1 }
 0x38c   : > { %v4024_v44 = vcombine.low %v3972_v59, %v3974_v16  ;;  %v4025_v36 = vcombine.low %v4013_v43, %v4015_v14 }
 0x38d   : > { %v3976_v21 = vpop.f32.mrf.mxu0  ;;  %v4017_v8 = vpop.f32.mrf.mxu1 }
 0x38e   : > { %v4028_v45 = vadd.f32 %v4024_v44, %v2893_v13  ;;  %v4029_v60 = vadd.f32 %v4025_v36, %v2894_v46 }
 0x38f   : > { %v3977_v41 = vpop.f32.mrf.mxu0  ;;  %v4018_v56 = vpop.f32.mrf.mxu1 }
 0x390   : > { %4030 = vst [vmem:[%s298_s22] sm:$0xff] %v4028_v45  ;;  %4031 = vst [vmem:[%s298_s22 + $0x8] sm:$0xff] %v4029_v60 }
 0x391   : > { %4395 = shalt.err (!%p4392_p3)
}
 0x392   : > { %s4396_s19 = scalar_lea.hbm %s5558_s25, 256  ;;  %s4400_s26 = scalar_lea.hbm %s5609_s8, 512 }
 0x393   : > { %p4397_p4 = scmp.ne.s32.totalorder %s5558_s25, %s4396_s19  ;;  %p4401_p9 = scmp.lt.s32.totalorder %s5558_s25, %s5609_s8 }
 0x394   : > { %p4402_p10 = scmp.lt.s32.totalorder %s4400_s26, %s4396_s19 }
 0x395   : > { %p4398_p7 = pnand %p4397_p4, %p4548_p5 }
 0x396   : > { %p4403_p11 = por %p4402_p10, %p4401_p9 }
 0x397   : > { %p4399_p8 = pneg %p4398_p7 }
 0x399   : > { %p4404_p12 = pnand %p4403_p11, %p4399_p8 }
 0x39b   : > { %4407 = shalt.err (!%p4404_p12)
}
 0x39c   : > { %4315 = dma.vmem_to_hbm [thread:$0]  (%p4548_p5), %s5560_s20, 256, %s5558_s25, %s4033_s9  }
 0x39d PF: > { %p4321_p13 = scmp.ge.s32.totalorder %s4442_s30, 2  ;;  %s4059_s24 = sand.u32 1, %s4430_s27  }
 0x39e   : > { %s4060_s17 = scalar_lea.sflag [#allocation5], %s4059_s24 }
 0x39f   : > { %p4318_p0 = pnand %p4321_p13, %p4552_p6 }
 0x3a1   : > { %p4319_p1 = pneg %p4318_p0 }
 0x3a3   : > { %4425 = dma.done.wait (%p4319_p1), %s4060_s17, 256  }
 0x3a4   : > { %4427 = vsyncadd (%p4319_p1), %s4060_s17, 4294967040  ;;  %p18_p2 = scmp.ge.s32.totalorder %s4535_s11, 4   ;;  %s5719_s27 = smov %s4434_s28 }
 0x3a5   : > { %s5720_s28 = smov %s4438_s29  ;;  %s5721_s29 = smov %s4546_s14 }
 0x3a6   : > { %s5722_s30 = smov %s4535_s11  ;;  %20 = sbr.rel (!%p18_p2) target bundleno = 3 (0x3), region = 97 }
 0x3ab   :  { %4065 = vsyncpa [#allocation5], 1 }
 0x3ac   :  { %4067 = vsyncpa [#allocation5 + $0x1], 1 }

</bundles_post_ra>
